<compile_context>
chip_gen: v7x
topology: tpu7x:2x2x1
jax: 0.10.0
libtpu: 0.0.40
codegen_flags: <defaults>
</compile_context>

<pallas_src>
import functools
import numpy as np

import jax
import jax.numpy as jnp
from jax.experimental import pallas as pl
from jax.experimental.pallas import tpu as pltpu


# ----------------------------------------------------------------------------
# helpers
# ----------------------------------------------------------------------------
def _round_up(x, m):
    return ((x + m - 1) // m) * m


def _vmem_capacity_bytes():
    # Generation-aware budget; fall back to the smallest (v7x: 64 MiB) VMEM.
    try:
        return int(pltpu.get_tpu_info().vmem_capacity_bytes)
    except Exception:
        return 64 * 1024 * 1024


def _head_vmem_estimate(sh, H, W, c2t, cm_pad, co_pad):
    acc = (H + 2) * W * cm_pad * 4                  # resident f32 accumulator
    x_blk = 2 * sh * (W + 2) * c2t * 2              # bf16 strip, double buffered
    w3_blk = 2 * 9 * c2t * cm_pad * 2               # bf16 weight tile, double buffered
    out_blk = 2 * H * W * co_pad * 4                # f32 whole-image output
    w1_blk = 2 * cm_pad * co_pad * 2
    temps = 3 * sh * W * c2t * 2 + 2 * sh * W * cm_pad * 4   # patches + per-dy sums
    return acc + x_blk + w3_blk + out_blk + w1_blk + temps


def _choose_head_tiles(H, W, C2, cm_pad, co_pad):
    budget = int(0.6 * _vmem_capacity_bytes())
    sh_cands = [d for d in (16, 8, 4, 2, 1) if H % d == 0]
    c2_cands = [t for t in (2048, 1024, 512, 256, 128) if t <= C2 and C2 % t == 0] or [C2]
    for sh in sh_cands:
        for c2t in c2_cands:
            if _head_vmem_estimate(sh, H, W, c2t, cm_pad, co_pad) <= budget:
                return sh, c2t
    return sh_cands[-1], c2_cands[-1]


# ----------------------------------------------------------------------------
# Pallas kernels
# ----------------------------------------------------------------------------
def _branch_kernel(x_ref, w_ref, s_ref, b_ref, o_ref):
    # Fused pyramid branches: all pooled pixels x all 4 branch weights in one
    # bf16 matmul (f32 accumulate); BN folded into scale/bias; ReLU.
    y = jnp.dot(x_ref[...], w_ref[...], preferred_element_type=jnp.float32)
    o_ref[...] = jnp.maximum(y * s_ref[...] + b_ref[...], 0.0).astype(o_ref.dtype)


def fused_branch_conv_bn_relu(rows, w_all, s_all, b_all):
    M, C = rows.shape
    Call = w_all.shape[1]
    return pl.pallas_call(
        _branch_kernel,
        out_shape=jax.ShapeDtypeStruct((M, Call), jnp.float32),
        grid=(1,),
        in_specs=[
            pl.BlockSpec((M, C), lambda i: (0, 0)),
            pl.BlockSpec((C, Call), lambda i: (0, 0)),
            pl.BlockSpec((1, Call), lambda i: (0, 0)),
            pl.BlockSpec((1, Call), lambda i: (0, 0)),
        ],
        out_specs=pl.BlockSpec((M, Call), lambda i: (0, 0)),
    )(rows, w_all, s_all, b_all)


def _head_kernel(x_ref, w3_ref, s3_ref, b3_ref, w1_ref, b1_ref, o_ref, acc_ref):
    # x_ref  : (sh, W+2, c2t) bf16  non-overlapping row strip, 1-col zero halo L/R
    # w3_ref : (9, c2t, cm_pad) bf16  3x3 conv weights, tap-major
    # s3/b3  : (1, cm_pad) f32        folded BatchNorm scale / bias
    # w1_ref : (cm_pad, co_pad) bf16, b1_ref: (1, co_pad) f32   final 1x1 conv
    # o_ref  : (H, W, co_pad) f32     whole-image output (written at last step)
    # acc_ref: (H+2, W, cm_pad) f32   resident full-image accumulator
    #                                 (rows 0 and H+1 are discard rows)
    k = pl.program_id(1)
    r = pl.program_id(2)
    last = jnp.logical_and(k == pl.num_programs(1) - 1,
                           r == pl.num_programs(2) - 1)

    @pl.when(jnp.logical_and(k == 0, r == 0))
    def _init():
        acc_ref[...] = jnp.zeros_like(acc_ref)

    sh, Wc, c2t = x_ref.shape
    W = Wc - 2
    cm = acc_ref.shape[-1]

    xs = x_ref[...]
    # 3 column-tap patches, shared across the 3 row taps (3 relayout copies
    # instead of the previous 9).
    patches = [xs[:, dx:dx + W, :].reshape(sh * W, c2t) for dx in range(3)]

    for dy in range(3):
        part = jnp.dot(patches[0], w3_ref[dy * 3 + 0],
                       preferred_element_type=jnp.float32)
        part += jnp.dot(patches[1], w3_ref[dy * 3 + 1],
                        preferred_element_type=jnp.float32)
        part += jnp.dot(patches[2], w3_ref[dy * 3 + 2],
                        preferred_element_type=jnp.float32)
        # input rows [r*sh, r*sh+sh) scatter into output rows shifted by (1-dy);
        # the accumulator has one extra discard row at the top and bottom.
        row0 = r * sh + (2 - dy)
        acc_ref[pl.ds(row0, sh), :, :] += part.reshape(sh, W, cm)

    @pl.when(last)
    def _finish():
        # TODO(synk): Dropout(0.1) treated as identity (inference mode); training
        #             masking would use pltpu.prng_seed / pltpu.prng_random_bits.
        H = o_ref.shape[0]
        scale = s3_ref[...].reshape(1, 1, cm)
        bias = b3_ref[...].reshape(1, 1, cm)
        for c in range(H // sh):
            a = acc_ref[1 + c * sh: 1 + (c + 1) * sh, :, :]
            y = jnp.maximum(a * scale + bias, 0.0)
            out = jnp.dot(y.reshape(sh * W, cm).astype(jnp.bfloat16), w1_ref[...],
                          preferred_element_type=jnp.float32) + b1_ref[...]
            o_ref[c * sh:(c + 1) * sh, :, :] = out.reshape(sh, W, -1).astype(o_ref.dtype)


def psp_head_conv5(x_pad, w3, s3, b3, w1, b1, sh=None, c2t=None):
    """3x3 conv + folded BN + ReLU + (identity dropout) + 1x1 conv.

    x_pad: (N, H, W+2, C2) bf16 feature map with zero columns at 0 and W+1.
    """
    N, H, Wc, C2 = x_pad.shape
    W = Wc - 2
    Cm = w3.shape[-1]
    Co = w1.shape[-1]

    cm_pad = _round_up(Cm, 128)
    co_pad = _round_up(Co, 128)

    if sh is None or c2t is None:
        a_sh, a_c2t = _choose_head_tiles(H, W, C2, cm_pad, co_pad)
        sh = a_sh if sh is None else sh
        c2t = a_c2t if c2t is None else c2t
    assert H % sh == 0 and C2 % c2t == 0
    nr = H // sh
    nk = C2 // c2t

    # lane-dense (multiple-of-128) Cm / Co padding; padded w1 rows are zero so
    # padded Cm channels never reach the output, padded Co cols are sliced off.
    w3b = jnp.pad(w3, ((0, 0), (0, 0), (0, cm_pad - Cm))).astype(jnp.bfloat16)
    s3p = jnp.pad(s3, ((0, 0), (0, cm_pad - Cm)))
    b3p = jnp.pad(b3, ((0, 0), (0, cm_pad - Cm)))
    w1p = jnp.pad(w1, ((0, cm_pad - Cm), (0, co_pad - Co))).astype(jnp.bfloat16)
    b1p = jnp.pad(b1, ((0, 0), (0, co_pad - Co)))

    vmem_cap = _vmem_capacity_bytes()

    out = pl.pallas_call(
        _head_kernel,
        out_shape=jax.ShapeDtypeStruct((N, H, W, co_pad), jnp.float32),
        grid=(N, nk, nr),
        in_specs=[
            pl.BlockSpec((None, sh, Wc, c2t), lambda n, k, r: (n, r, 0, k)),
            # w3 tile index only depends on k -> DMA'd once per image.
            pl.BlockSpec((9, c2t, cm_pad), lambda n, k, r: (0, k, 0)),
            # TODO(synk): constant-index blocks below could be single-buffered
            #             with pipeline_mode=pl.Buffered(1) to reclaim VMEM.
            pl.BlockSpec((1, cm_pad), lambda n, k, r: (0, 0)),
            pl.BlockSpec((1, cm_pad), lambda n, k, r: (0, 0)),
            pl.BlockSpec((cm_pad, co_pad), lambda n, k, r: (0, 0)),
            pl.BlockSpec((1, co_pad), lambda n, k, r: (0, 0)),
        ],
        out_specs=pl.BlockSpec((None, H, W, co_pad), lambda n, k, r: (n, 0, 0, 0)),
        scratch_shapes=[pltpu.VMEM((H + 2, W, cm_pad), jnp.float32)],
        compiler_params=pltpu.CompilerParams(
            # k (C2 reduction) and r (row strips share the resident accumulator
            # and the whole-image output block) must stay sequential.
            # TODO(synk): for batch-1 on v7x, split the image into two
            #             independent halves to feed both TensorCores.
            dimension_semantics=("parallel", "arbitrary", "arbitrary"),
            vmem_limit_bytes=int(min(0.85 * vmem_cap, 100 * 1024 * 1024)),
        ),
    )(x_pad, w3b, s3p, b3p, w1p, b1p)

    return out[..., :Co]


# ----------------------------------------------------------------------------
# Glue: pooling / upsampling matrices, BN folding, parameter init
# ----------------------------------------------------------------------------
def adaptive_pool_matrix(H, s):
    # Matches torch AdaptiveAvgPool2d bin boundaries: [floor(i*H/s), ceil((i+1)*H/s))
    P = np.zeros((s, H), np.float32)
    for i in range(s):
        start = (i * H) // s
        end = -(-((i + 1) * H) // s)
        P[i, start:end] = 1.0 / (end - start)
    return jnp.asarray(P)


def bilinear_up_matrix(H, s):
    # F.interpolate(mode='bilinear', align_corners=True) as an (H, s) matrix.
    U = np.zeros((H, s), np.float32)
    if s == 1:
        U[:, 0] = 1.0
    else:
        for h in range(H):
            src = h * (s - 1) / (H - 1)
            i0 = int(np.floor(src))
            i1 = min(i0 + 1, s - 1)
            w1 = src - i0
            U[h, i0] += 1.0 - w1
            U[h, i1] += w1
    return jnp.asarray(U)


def fold_bn(gamma, beta, mean, var, eps=1e-5):
    scale = gamma / jnp.sqrt(var + eps)
    bias = beta - mean * scale
    return scale.reshape(1, -1), bias.reshape(1, -1)


def init_params(key, in_channels, out_channels):
    Cb = in_channels // 4       # pyramid branch channels
    Cm = in_channels // 4       # inter_channels
    C2 = in_channels * 2
    keys = jax.random.split(key, 32)
    k = iter(range(32))

    def bn_params(c):
        gamma = 1.0 + 0.1 * jax.random.normal(keys[next(k)], (c,), jnp.float32)
        beta = 0.1 * jax.random.normal(keys[next(k)], (c,), jnp.float32)
        mean = 0.1 * jax.random.normal(keys[next(k)], (c,), jnp.float32)
        var = 0.5 + jnp.abs(jax.random.normal(keys[next(k)], (c,), jnp.float32))
        return fold_bn(gamma, beta, mean, var)

    branches = []
    for _ in range(4):
        # torch weight (Cb, Cin, 1, 1), no bias
        w_t = 0.1 * jax.random.normal(keys[next(k)], (Cb, in_channels, 1, 1), jnp.float32)
        scale, bias = bn_params(Cb)
        branches.append({"w": w_t[:, :, 0, 0].T, "scale": scale, "bias": bias})

    # torch Conv2d(2*in, inter, 3, padding=1, bias=False): weight (Cm, C2, 3, 3)
    w3_t = 0.1 * jax.random.normal(keys[next(k)], (Cm, C2, 3, 3), jnp.float32)
    # -> (ky, kx, Cin, Cout) -> (9, Cin, Cout)
    w3 = jnp.transpose(w3_t, (2, 3, 1, 0)).reshape(9, C2, Cm)
    s3, b3 = bn_params(Cm)

    # torch Conv2d(inter, out, 1) with bias
    w1_t = 0.1 * jax.random.normal(keys[next(k)], (out_channels, Cm, 1, 1), jnp.float32)
    b1 = 0.1 * jax.random.normal(keys[next(k)], (out_channels,), jnp.float32)
    return {
        "branches": branches,
        "w3": w3, "s3": s3, "b3": b3,
        "w1": w1_t[:, :, 0, 0].T, "b1": b1.reshape(1, -1),
    }


# ----------------------------------------------------------------------------
# Full forward (NCHW in, NCHW out)
# ----------------------------------------------------------------------------
def pyramid_concat_pad(x, params):
    """x: (N,H,W,C) f32 -> (N,H,W+2,2C) bf16: [input | 4 upsampled pooled
    branches], with a 1-column zero halo on the left/right (fused into the
    channel concat that materializes the feature map anyway)."""
    N, H, W, C = x.shape
    Cb = params["branches"][0]["w"].shape[1]
    sizes = (1, 2, 3, 6)

    # pooled pixels of all branches as one row block (N, 50, C)
    pool_rows = []
    for s in sizes:
        Ph = adaptive_pool_matrix(H, s)
        Pw = adaptive_pool_matrix(W, s)
        pooled = jnp.einsum("ih,jw,nhwc->nijc", Ph, Pw, x)      # (N, s, s, C)
        pool_rows.append(pooled.reshape(N, s * s, C))
    rows = jnp.concatenate(pool_rows, axis=1)                    # (N, 50, C)
    n_rows = rows.shape[1]
    m = N * n_rows
    m_pad = _round_up(m, 8)
    rows = jnp.pad(rows.reshape(m, C), ((0, m_pad - m), (0, 0))).astype(jnp.bfloat16)

    # single fused Pallas call for all 4 branch 1x1 convs + BN + ReLU (bf16 MXU)
    w_all = jnp.concatenate([p["w"] for p in params["branches"]], axis=1)       # (C, 4Cb)
    s_all = jnp.concatenate([p["scale"] for p in params["branches"]], axis=1)
    b_all = jnp.concatenate([p["bias"] for p in params["branches"]], axis=1)
    call = w_all.shape[1]
    call_pad = _round_up(call, 128)
    w_all = jnp.pad(w_all, ((0, 0), (0, call_pad - call))).astype(jnp.bfloat16)
    s_all = jnp.pad(s_all, ((0, 0), (0, call_pad - call)))
    b_all = jnp.pad(b_all, ((0, 0), (0, call_pad - call)))

    y_all = fused_branch_conv_bn_relu(rows, w_all, s_all, b_all)
    y_all = y_all[:m, :call].reshape(N, n_rows, call)

    feats = [x]
    off = 0
    for bi, s in enumerate(sizes):
        yb = y_all[:, off:off + s * s, bi * Cb:(bi + 1) * Cb].reshape(N, s, s, Cb)
        off += s * s
        Uh = bilinear_up_matrix(H, s)
        Uw = bilinear_up_matrix(W, s)
        feats.append(jnp.einsum("hi,wj,nijc->nhwc", Uh, Uw, yb))

    # 1-col zero halo + bf16 cast per feature, then channel concat: XLA fuses
    # the pads/casts into the concat, so no separate halo pass over the map.
    padded = [jnp.pad(f, ((0, 0), (0, 0), (1, 1), (0, 0))).astype(jnp.bfloat16)
              for f in feats]
    return jnp.concatenate(padded, axis=-1)                      # (N, H, W+2, 2C)


@functools.partial(jax.jit, static_argnames=("sh", "c2t"))
def psp_head_forward(x_nchw, params, sh=None, c2t=None):
    x = jnp.transpose(x_nchw, (0, 2, 3, 1))          # NCHW -> NHWC
    x_pad = pyramid_concat_pad(x, params)
    out = psp_head_conv5(x_pad, params["w3"], params["s3"], params["b3"],
                         params["w1"], params["b1"], sh=sh, c2t=c2t)
    return jnp.transpose(out, (0, 3, 1, 2))           # NHWC -> NCHW


# Pure-JAX reference (mirrors the kernel's bf16 feature / weight traffic).
def _ref_forward(x_nchw, params):
    x = jnp.transpose(x_nchw, (0, 2, 3, 1))
    N, H, W, C = x.shape
    feats = [x]
    for s, p in zip((1, 2, 3, 6), params["branches"]):
        Ph = adaptive_pool_matrix(H, s)
        Pw = adaptive_pool_matrix(W, s)
        pooled = jnp.einsum("ih,jw,nhwc->nijc", Ph, Pw, x)
        pooled = pooled.astype(jnp.bfloat16).astype(jnp.float32)
        wb = p["w"].astype(jnp.bfloat16).astype(jnp.float32)
        y = jnp.maximum(jnp.einsum("nijc,cd->nijd", pooled, wb)
                        * p["scale"].reshape(1, 1, 1, -1)
                        + p["bias"].reshape(1, 1, 1, -1), 0.0)
        Uh = bilinear_up_matrix(H, s)
        Uw = bilinear_up_matrix(W, s)
        feats.append(jnp.einsum("hi,wj,nijc->nhwc", Uh, Uw, y))
    x_cat = jnp.concatenate(feats, axis=-1)
    x_cat = x_cat.astype(jnp.bfloat16).astype(jnp.float32)
    C2 = x_cat.shape[-1]
    w3 = params["w3"].astype(jnp.bfloat16).astype(jnp.float32)
    w_hwio = w3.reshape(3, 3, C2, -1)
    y = jax.lax.conv_general_dilated(x_cat, w_hwio, (1, 1), "SAME",
                                     dimension_numbers=("NHWC", "HWIO", "NHWC"))
    y = jnp.maximum(y * params["s3"].reshape(1, 1, 1, -1)
                    + params["b3"].reshape(1, 1, 1, -1), 0.0)
    y = y.astype(jnp.bfloat16).astype(jnp.float32)
    w1 = params["w1"].astype(jnp.bfloat16).astype(jnp.float32)
    out = jnp.einsum("nhwc,cd->nhwd", y, w1) + params["b1"].reshape(1, 1, 1, -1)
    return jnp.transpose(out, (0, 3, 1, 2))


if __name__ == "__main__":
    key = jax.random.PRNGKey(0)
    kx, kp, kx2, kp2 = jax.random.split(key, 4)

    # Config 1: small default (batch=2, in_channels=16, 16x16 spatial).
    N, in_channels, H, W = 2, 16, 16, 16
    out_channels = 8
    x = jax.random.normal(kx, (N, in_channels, H, W), jnp.float32)   # NCHW input
    params = init_params(kp, in_channels, out_channels)

    out = jax.block_until_ready(psp_head_forward(x, params))
    assert out.shape == (N, out_channels, H, W), out.shape
    ref = jax.block_until_ready(_ref_forward(x, params))
    np.testing.assert_allclose(np.asarray(out), np.asarray(ref), rtol=2e-2, atol=2e-2)

    # Config 2: exercises the multi-strip / multi-reduction-tile grid path
    # (nr=4 row strips, nk=2 C2 tiles) with explicit tile overrides.
    N2, in_ch2, H2, W2, out_ch2 = 1, 128, 16, 16, 8
    x2 = jax.random.normal(kx2, (N2, in_ch2, H2, W2), jnp.float32)
    params2 = init_params(kp2, in_ch2, out_ch2)
    out2 = jax.block_until_ready(psp_head_forward(x2, params2, sh=4, c2t=128))
    assert out2.shape == (N2, out_ch2, H2, W2), out2.shape
    ref2 = jax.block_until_ready(_ref_forward(x2, params2))
    np.testing.assert_allclose(np.asarray(out2), np.asarray(ref2), rtol=2e-2, atol=2e-2)

    print("KERNEL_OK")
</pallas_src>

<mosaic_0001>
module attributes {stable_mosaic.version = 11 : i64} {
  func.func @_branch_kernel(%arg0: i32, %arg1: memref<104x16xbf16, #tpu.memory_space<vmem>>, %arg2: memref<16x128xbf16, #tpu.memory_space<vmem>>, %arg3: memref<1x128xf32, #tpu.memory_space<vmem>>, %arg4: memref<1x128xf32, #tpu.memory_space<vmem>>, %arg5: memref<104x128xf32, #tpu.memory_space<vmem>>) attributes {dimension_semantics = [#tpu.dimension_semantics<arbitrary>], iteration_bounds = array<i64: 1>, scalar_prefetch = 0 : i64, scratch_operands = 0 : i64, tpu.core_type = #tpu.core_type<tc>, window_params = [{pipeline_mode = #tpu.pipeline_mode<synchronous>, transform_indices = @transform_0, window_bounds = array<i64: 104, 16>}, {pipeline_mode = #tpu.pipeline_mode<synchronous>, transform_indices = @transform_1, window_bounds = array<i64: 16, 128>}, {pipeline_mode = #tpu.pipeline_mode<synchronous>, transform_indices = @transform_2, window_bounds = array<i64: 1, 128>}, {pipeline_mode = #tpu.pipeline_mode<synchronous>, transform_indices = @transform_3, window_bounds = array<i64: 1, 128>}, {pipeline_mode = #tpu.pipeline_mode<synchronous>, transform_indices = @transform_4, window_bounds = array<i64: 104, 128>}]} {
    %c0 = arith.constant 0 : index
    %c0_0 = arith.constant 0 : index
    %0 = vector.load %arg1[%c0, %c0_0] : memref<104x16xbf16, #tpu.memory_space<vmem>>, vector<104x16xbf16>
    %c0_1 = arith.constant 0 : index
    %c0_2 = arith.constant 0 : index
    %1 = vector.load %arg2[%c0_1, %c0_2] : memref<16x128xbf16, #tpu.memory_space<vmem>>, vector<16x128xbf16>
    %cst = arith.constant dense<0.000000e+00> : vector<104x128xf32>
    %2 = tpu.matmul %0, %1, %cst {dimension_numbers = #tpu.dot_dimension_numbers<[1], [0], [0], [1], [0, 0, 1, 1], [], []>} : vector<104x16xbf16>, vector<16x128xbf16>, vector<104x128xf32> -> vector<104x128xf32>
    %c0_3 = arith.constant 0 : index
    %c0_4 = arith.constant 0 : index
    %3 = vector.load %arg3[%c0_3, %c0_4] : memref<1x128xf32, #tpu.memory_space<vmem>>, vector<1x128xf32>
    %4 = vector.broadcast %3 : vector<1x128xf32> to vector<104x128xf32>
    %5 = arith.mulf %2, %4 : vector<104x128xf32>
    %c0_5 = arith.constant 0 : index
    %c0_6 = arith.constant 0 : index
    %6 = vector.load %arg4[%c0_5, %c0_6] : memref<1x128xf32, #tpu.memory_space<vmem>>, vector<1x128xf32>
    %7 = vector.broadcast %6 : vector<1x128xf32> to vector<104x128xf32>
    %8 = arith.addf %5, %7 : vector<104x128xf32>
    %cst_7 = arith.constant 0.000000e+00 : f32
    %9 = vector.broadcast %cst_7 : f32 to vector<104x128xf32>
    %10 = arith.maximumf %8, %9 : vector<104x128xf32>
    %c0_8 = arith.constant 0 : index
    %c0_9 = arith.constant 0 : index
    %11 = vector.load %arg5[%c0_8, %c0_9] : memref<104x128xf32, #tpu.memory_space<vmem>>, vector<104x128xf32>
    tpu.vector_store %arg5[%c0_8, %c0_9], %10 {strides = array<i32>} : memref<104x128xf32, #tpu.memory_space<vmem>>, vector<104x128xf32>,
    return
  }
  func.func @transform_0(%arg0: i32) -> (i32, i32) {
    %c0_i32 = arith.constant 0 : i32
    %c0_i32_0 = arith.constant 0 : i32
    %c0_i32_1 = arith.constant 0 : i32
    return %c0_i32, %c0_i32_0 : i32, i32
  }
  func.func @transform_1(%arg0: i32) -> (i32, i32) {
    %c0_i32 = arith.constant 0 : i32
    %c0_i32_0 = arith.constant 0 : i32
    %c0_i32_1 = arith.constant 0 : i32
    return %c0_i32, %c0_i32_0 : i32, i32
  }
  func.func @transform_2(%arg0: i32) -> (i32, i32) {
    %c0_i32 = arith.constant 0 : i32
    %c0_i32_0 = arith.constant 0 : i32
    %c0_i32_1 = arith.constant 0 : i32
    return %c0_i32, %c0_i32_0 : i32, i32
  }
  func.func @transform_3(%arg0: i32) -> (i32, i32) {
    %c0_i32 = arith.constant 0 : i32
    %c0_i32_0 = arith.constant 0 : i32
    %c0_i32_1 = arith.constant 0 : i32
    return %c0_i32, %c0_i32_0 : i32, i32
  }
  func.func @transform_4(%arg0: i32) -> (i32, i32) {
    %c0_i32 = arith.constant 0 : i32
    %c0_i32_0 = arith.constant 0 : i32
    %c0_i32_1 = arith.constant 0 : i32
    return %c0_i32, %c0_i32_0 : i32, i32
  }
}

module attributes {stable_mosaic.version = 11 : i64} {
  func.func @_head_kernel(%arg0: i32, %arg1: i32, %arg2: i32, %arg3: memref<1x16x18x32xbf16, #tpu.memory_space<vmem>>, %arg4: memref<9x32x128xbf16, #tpu.memory_space<vmem>>, %arg5: memref<1x128xf32, #tpu.memory_space<vmem>>, %arg6: memref<1x128xf32, #tpu.memory_space<vmem>>, %arg7: memref<128x128xbf16, #tpu.memory_space<vmem>>, %arg8: memref<1x128xf32, #tpu.memory_space<vmem>>, %arg9: memref<1x16x16x128xf32, #tpu.memory_space<vmem>>, %arg10: memref<18x16x128xf32, #tpu.memory_space<vmem>>) attributes {dimension_semantics = [#tpu.dimension_semantics<parallel>, #tpu.dimension_semantics<arbitrary>, #tpu.dimension_semantics<arbitrary>], iteration_bounds = array<i64: 2, 1, 1>, scalar_prefetch = 0 : i64, scratch_operands = 1 : i64, tpu.core_type = #tpu.core_type<tc>, window_params = [{transform_indices = @transform_0, window_bounds = array<i64: 1, 16, 18, 32>}, {transform_indices = @transform_1, window_bounds = array<i64: 9, 32, 128>}, {pipeline_mode = #tpu.pipeline_mode<synchronous>, transform_indices = @transform_2, window_bounds = array<i64: 1, 128>}, {pipeline_mode = #tpu.pipeline_mode<synchronous>, transform_indices = @transform_3, window_bounds = array<i64: 1, 128>}, {pipeline_mode = #tpu.pipeline_mode<synchronous>, transform_indices = @transform_4, window_bounds = array<i64: 128, 128>}, {pipeline_mode = #tpu.pipeline_mode<synchronous>, transform_indices = @transform_5, window_bounds = array<i64: 1, 128>}, {transform_indices = @transform_6, window_bounds = array<i64: 1, 16, 16, 128>}]} {
    %c0_i32 = arith.constant 0 : i32
    %0 = arith.cmpi eq, %arg1, %c0_i32 : i32
    %c0_i32_0 = arith.constant 0 : i32
    %1 = arith.cmpi eq, %arg2, %c0_i32_0 : i32
    %2 = arith.andi %0, %1 : i1
    %c0_i32_1 = arith.constant 0 : i32
    %3 = arith.cmpi eq, %arg1, %c0_i32_1 : i32
    %c0_i32_2 = arith.constant 0 : i32
    %4 = arith.cmpi eq, %arg2, %c0_i32_2 : i32
    %5 = arith.andi %3, %4 : i1
    %6 = arith.extui %5 : i1 to i32
    %c0_i32_3 = arith.constant 0 : i32
    %7 = arith.cmpi ne, %6, %c0_i32_3 : i32
    scf.if %7 {
      %cst_50 = arith.constant 0.000000e+00 : f32
      %75 = vector.broadcast %cst_50 : f32 to vector<18x16x128xf32>
      %c0_51 = arith.constant 0 : index
      %c0_52 = arith.constant 0 : index
      %c0_53 = arith.constant 0 : index
      %76 = vector.load %arg10[%c0_51, %c0_52, %c0_53] : memref<18x16x128xf32, #tpu.memory_space<vmem>>, vector<18x16x128xf32>
      tpu.vector_store %arg10[%c0_51, %c0_52, %c0_53], %75 {strides = array<i32>} : memref<18x16x128xf32, #tpu.memory_space<vmem>>, vector<18x16x128xf32>,
    } else {
    }
    %c0 = arith.constant 0 : index
    %c0_4 = arith.constant 0 : index
    %c0_5 = arith.constant 0 : index
    %c0_6 = arith.constant 0 : index
    %8 = vector.load %arg3[%c0, %c0_4, %c0_5, %c0_6] : memref<1x16x18x32xbf16, #tpu.memory_space<vmem>>, vector<1x16x18x32xbf16>
    %9 = vector.shape_cast %8 : vector<1x16x18x32xbf16> to vector<16x18x32xbf16>
    %10 = vector.extract_strided_slice %9 {offsets = [0, 0, 0], sizes = [16, 16, 32], strides = [1, 1, 1]} : vector<16x18x32xbf16> to vector<16x16x32xbf16>
    %11 = vector.shape_cast %10 : vector<16x16x32xbf16> to vector<256x32xbf16>
    %12 = vector.extract_strided_slice %9 {offsets = [0, 1, 0], sizes = [16, 16, 32], strides = [1, 1, 1]} : vector<16x18x32xbf16> to vector<16x16x32xbf16>
    %13 = vector.shape_cast %12 : vector<16x16x32xbf16> to vector<256x32xbf16>
    %14 = vector.extract_strided_slice %9 {offsets = [0, 2, 0], sizes = [16, 16, 32], strides = [1, 1, 1]} : vector<16x18x32xbf16> to vector<16x16x32xbf16>
    %15 = vector.shape_cast %14 : vector<16x16x32xbf16> to vector<256x32xbf16>
    %c0_7 = arith.constant 0 : index
    %c0_8 = arith.constant 0 : index
    %c0_9 = arith.constant 0 : index
    %16 = vector.load %arg4[%c0_7, %c0_8, %c0_9] : memref<9x32x128xbf16, #tpu.memory_space<vmem>>, vector<1x32x128xbf16>
    %17 = vector.shape_cast %16 : vector<1x32x128xbf16> to vector<32x128xbf16>
    %cst = arith.constant dense<0.000000e+00> : vector<256x128xf32>
    %18 = tpu.matmul %11, %17, %cst {dimension_numbers = #tpu.dot_dimension_numbers<[1], [0], [0], [1], [0, 0, 1, 1], [], []>} : vector<256x32xbf16>, vector<32x128xbf16>, vector<256x128xf32> -> vector<256x128xf32>
    %c1 = arith.constant 1 : index
    %c0_10 = arith.constant 0 : index
    %c0_11 = arith.constant 0 : index
    %19 = vector.load %arg4[%c1, %c0_10, %c0_11] : memref<9x32x128xbf16, #tpu.memory_space<vmem>>, vector<1x32x128xbf16>
    %20 = vector.shape_cast %19 : vector<1x32x128xbf16> to vector<32x128xbf16>
    %cst_12 = arith.constant dense<0.000000e+00> : vector<256x128xf32>
    %21 = tpu.matmul %13, %20, %cst_12 {dimension_numbers = #tpu.dot_dimension_numbers<[1], [0], [0], [1], [0, 0, 1, 1], [], []>} : vector<256x32xbf16>, vector<32x128xbf16>, vector<256x128xf32> -> vector<256x128xf32>
    %22 = arith.addf %18, %21 : vector<256x128xf32>
    %c2 = arith.constant 2 : index
    %c0_13 = arith.constant 0 : index
    %c0_14 = arith.constant 0 : index
    %23 = vector.load %arg4[%c2, %c0_13, %c0_14] : memref<9x32x128xbf16, #tpu.memory_space<vmem>>, vector<1x32x128xbf16>
    %24 = vector.shape_cast %23 : vector<1x32x128xbf16> to vector<32x128xbf16>
    %cst_15 = arith.constant dense<0.000000e+00> : vector<256x128xf32>
    %25 = tpu.matmul %15, %24, %cst_15 {dimension_numbers = #tpu.dot_dimension_numbers<[1], [0], [0], [1], [0, 0, 1, 1], [], []>} : vector<256x32xbf16>, vector<32x128xbf16>, vector<256x128xf32> -> vector<256x128xf32>
    %26 = arith.addf %22, %25 : vector<256x128xf32>
    %c16_i32 = arith.constant 16 : i32
    %27 = arith.muli %arg2, %c16_i32 : i32
    %c2_i32 = arith.constant 2 : i32
    %28 = arith.addi %27, %c2_i32 : i32
    %29 = arith.index_cast %28 : i32 to index
    %c0_16 = arith.constant 0 : index
    %c0_17 = arith.constant 0 : index
    %30 = vector.load %arg10[%29, %c0_16, %c0_17] : memref<18x16x128xf32, #tpu.memory_space<vmem>>, vector<16x16x128xf32>
    %31 = vector.shape_cast %26 : vector<256x128xf32> to vector<16x16x128xf32>
    %32 = arith.addf %30, %31 : vector<16x16x128xf32>
    %33 = arith.index_cast %28 : i32 to index
    %c0_18 = arith.constant 0 : index
    %c0_19 = arith.constant 0 : index
    %34 = vector.load %arg10[%33, %c0_18, %c0_19] : memref<18x16x128xf32, #tpu.memory_space<vmem>>, vector<16x16x128xf32>
    tpu.vector_store %arg10[%33, %c0_18, %c0_19], %32 {strides = array<i32>} : memref<18x16x128xf32, #tpu.memory_space<vmem>>, vector<16x16x128xf32>,
    %c3 = arith.constant 3 : index
    %c0_20 = arith.constant 0 : index
    %c0_21 = arith.constant 0 : index
    %35 = vector.load %arg4[%c3, %c0_20, %c0_21] : memref<9x32x128xbf16, #tpu.memory_space<vmem>>, vector<1x32x128xbf16>
    %36 = vector.shape_cast %35 : vector<1x32x128xbf16> to vector<32x128xbf16>
    %cst_22 = arith.constant dense<0.000000e+00> : vector<256x128xf32>
    %37 = tpu.matmul %11, %36, %cst_22 {dimension_numbers = #tpu.dot_dimension_numbers<[1], [0], [0], [1], [0, 0, 1, 1], [], []>} : vector<256x32xbf16>, vector<32x128xbf16>, vector<256x128xf32> -> vector<256x128xf32>
    %c4 = arith.constant 4 : index
    %c0_23 = arith.constant 0 : index
    %c0_24 = arith.constant 0 : index
    %38 = vector.load %arg4[%c4, %c0_23, %c0_24] : memref<9x32x128xbf16, #tpu.memory_space<vmem>>, vector<1x32x128xbf16>
    %39 = vector.shape_cast %38 : vector<1x32x128xbf16> to vector<32x128xbf16>
    %cst_25 = arith.constant dense<0.000000e+00> : vector<256x128xf32>
    %40 = tpu.matmul %13, %39, %cst_25 {dimension_numbers = #tpu.dot_dimension_numbers<[1], [0], [0], [1], [0, 0, 1, 1], [], []>} : vector<256x32xbf16>, vector<32x128xbf16>, vector<256x128xf32> -> vector<256x128xf32>
    %41 = arith.addf %37, %40 : vector<256x128xf32>
    %c5 = arith.constant 5 : index
    %c0_26 = arith.constant 0 : index
    %c0_27 = arith.constant 0 : index
    %42 = vector.load %arg4[%c5, %c0_26, %c0_27] : memref<9x32x128xbf16, #tpu.memory_space<vmem>>, vector<1x32x128xbf16>
    %43 = vector.shape_cast %42 : vector<1x32x128xbf16> to vector<32x128xbf16>
    %cst_28 = arith.constant dense<0.000000e+00> : vector<256x128xf32>
    %44 = tpu.matmul %15, %43, %cst_28 {dimension_numbers = #tpu.dot_dimension_numbers<[1], [0], [0], [1], [0, 0, 1, 1], [], []>} : vector<256x32xbf16>, vector<32x128xbf16>, vector<256x128xf32> -> vector<256x128xf32>
    %45 = arith.addf %41, %44 : vector<256x128xf32>
    %c16_i32_29 = arith.constant 16 : i32
    %46 = arith.muli %arg2, %c16_i32_29 : i32
    %c1_i32 = arith.constant 1 : i32
    %47 = arith.addi %46, %c1_i32 : i32
    %48 = arith.index_cast %47 : i32 to index
    %c0_30 = arith.constant 0 : index
    %c0_31 = arith.constant 0 : index
    %49 = vector.load %arg10[%48, %c0_30, %c0_31] : memref<18x16x128xf32, #tpu.memory_space<vmem>>, vector<16x16x128xf32>
    %50 = vector.shape_cast %45 : vector<256x128xf32> to vector<16x16x128xf32>
    %51 = arith.addf %49, %50 : vector<16x16x128xf32>
    %52 = arith.index_cast %47 : i32 to index
    %c0_32 = arith.constant 0 : index
    %c0_33 = arith.constant 0 : index
    %53 = vector.load %arg10[%52, %c0_32, %c0_33] : memref<18x16x128xf32, #tpu.memory_space<vmem>>, vector<16x16x128xf32>
    tpu.vector_store %arg10[%52, %c0_32, %c0_33], %51 {strides = array<i32>} : memref<18x16x128xf32, #tpu.memory_space<vmem>>, vector<16x16x128xf32>,
    %c6 = arith.constant 6 : index
    %c0_34 = arith.constant 0 : index
    %c0_35 = arith.constant 0 : index
    %54 = vector.load %arg4[%c6, %c0_34, %c0_35] : memref<9x32x128xbf16, #tpu.memory_space<vmem>>, vector<1x32x128xbf16>
    %55 = vector.shape_cast %54 : vector<1x32x128xbf16> to vector<32x128xbf16>
    %cst_36 = arith.constant dense<0.000000e+00> : vector<256x128xf32>
    %56 = tpu.matmul %11, %55, %cst_36 {dimension_numbers = #tpu.dot_dimension_numbers<[1], [0], [0], [1], [0, 0, 1, 1], [], []>} : vector<256x32xbf16>, vector<32x128xbf16>, vector<256x128xf32> -> vector<256x128xf32>
    %c7 = arith.constant 7 : index
    %c0_37 = arith.constant 0 : index
    %c0_38 = arith.constant 0 : index
    %57 = vector.load %arg4[%c7, %c0_37, %c0_38] : memref<9x32x128xbf16, #tpu.memory_space<vmem>>, vector<1x32x128xbf16>
    %58 = vector.shape_cast %57 : vector<1x32x128xbf16> to vector<32x128xbf16>
    %cst_39 = arith.constant dense<0.000000e+00> : vector<256x128xf32>
    %59 = tpu.matmul %13, %58, %cst_39 {dimension_numbers = #tpu.dot_dimension_numbers<[1], [0], [0], [1], [0, 0, 1, 1], [], []>} : vector<256x32xbf16>, vector<32x128xbf16>, vector<256x128xf32> -> vector<256x128xf32>
    %60 = arith.addf %56, %59 : vector<256x128xf32>
    %c8 = arith.constant 8 : index
    %c0_40 = arith.constant 0 : index
    %c0_41 = arith.constant 0 : index
    %61 = vector.load %arg4[%c8, %c0_40, %c0_41] : memref<9x32x128xbf16, #tpu.memory_space<vmem>>, vector<1x32x128xbf16>
    %62 = vector.shape_cast %61 : vector<1x32x128xbf16> to vector<32x128xbf16>
    %cst_42 = arith.constant dense<0.000000e+00> : vector<256x128xf32>
    %63 = tpu.matmul %15, %62, %cst_42 {dimension_numbers = #tpu.dot_dimension_numbers<[1], [0], [0], [1], [0, 0, 1, 1], [], []>} : vector<256x32xbf16>, vector<32x128xbf16>, vector<256x128xf32> -> vector<256x128xf32>
    %64 = arith.addf %60, %63 : vector<256x128xf32>
    %c16_i32_43 = arith.constant 16 : i32
    %65 = arith.muli %arg2, %c16_i32_43 : i32
    %c0_i32_44 = arith.constant 0 : i32
    %66 = arith.addi %65, %c0_i32_44 : i32
    %67 = arith.index_cast %66 : i32 to index
    %c0_45 = arith.constant 0 : index
    %c0_46 = arith.constant 0 : index
    %68 = vector.load %arg10[%67, %c0_45, %c0_46] : memref<18x16x128xf32, #tpu.memory_space<vmem>>, vector<16x16x128xf32>
    %69 = vector.shape_cast %64 : vector<256x128xf32> to vector<16x16x128xf32>
    %70 = arith.addf %68, %69 : vector<16x16x128xf32>
    %71 = arith.index_cast %66 : i32 to index
    %c0_47 = arith.constant 0 : index
    %c0_48 = arith.constant 0 : index
    %72 = vector.load %arg10[%71, %c0_47, %c0_48] : memref<18x16x128xf32, #tpu.memory_space<vmem>>, vector<16x16x128xf32>
    tpu.vector_store %arg10[%71, %c0_47, %c0_48], %70 {strides = array<i32>} : memref<18x16x128xf32, #tpu.memory_space<vmem>>, vector<16x16x128xf32>,
    %73 = arith.extui %2 : i1 to i32
    %c0_i32_49 = arith.constant 0 : i32
    %74 = arith.cmpi ne, %73, %c0_i32_49 : i32
    scf.if %74 {
      %c0_50 = arith.constant 0 : index
      %c0_51 = arith.constant 0 : index
      %75 = vector.load %arg5[%c0_50, %c0_51] : memref<1x128xf32, #tpu.memory_space<vmem>>, vector<1x128xf32>
      %76 = vector.shape_cast %75 : vector<1x128xf32> to vector<1x1x128xf32>
      %c0_52 = arith.constant 0 : index
      %c0_53 = arith.constant 0 : index
      %77 = vector.load %arg6[%c0_52, %c0_53] : memref<1x128xf32, #tpu.memory_space<vmem>>, vector<1x128xf32>
      %78 = vector.shape_cast %77 : vector<1x128xf32> to vector<1x1x128xf32>
      %c1_54 = arith.constant 1 : index
      %c0_55 = arith.constant 0 : index
      %c0_56 = arith.constant 0 : index
      %79 = vector.load %arg10[%c1_54, %c0_55, %c0_56] : memref<18x16x128xf32, #tpu.memory_space<vmem>>, vector<16x16x128xf32>
      %80 = vector.broadcast %76 : vector<1x1x128xf32> to vector<16x16x128xf32>
      %81 = arith.mulf %79, %80 : vector<16x16x128xf32>
      %82 = vector.broadcast %78 : vector<1x1x128xf32> to vector<16x16x128xf32>
      %83 = arith.addf %81, %82 : vector<16x16x128xf32>
      %cst_57 = arith.constant 0.000000e+00 : f32
      %84 = vector.broadcast %cst_57 : f32 to vector<16x16x128xf32>
      %85 = arith.maximumf %83, %84 : vector<16x16x128xf32>
      %86 = vector.shape_cast %85 : vector<16x16x128xf32> to vector<256x128xf32>
      %87 = arith.truncf %86 : vector<256x128xf32> to vector<256x128xbf16>
      %c0_58 = arith.constant 0 : index
      %c0_59 = arith.constant 0 : index
      %88 = vector.load %arg7[%c0_58, %c0_59] : memref<128x128xbf16, #tpu.memory_space<vmem>>, vector<128x128xbf16>
      %cst_60 = arith.constant dense<0.000000e+00> : vector<256x128xf32>
      %89 = tpu.matmul %87, %88, %cst_60 {dimension_numbers = #tpu.dot_dimension_numbers<[1], [0], [0], [1], [0, 0, 1, 1], [], []>} : vector<256x128xbf16>, vector<128x128xbf16>, vector<256x128xf32> -> vector<256x128xf32>
      %c0_61 = arith.constant 0 : index
      %c0_62 = arith.constant 0 : index
      %90 = vector.load %arg8[%c0_61, %c0_62] : memref<1x128xf32, #tpu.memory_space<vmem>>, vector<1x128xf32>
      %91 = vector.broadcast %90 : vector<1x128xf32> to vector<256x128xf32>
      %92 = arith.addf %89, %91 : vector<256x128xf32>
      %93 = vector.shape_cast %92 : vector<256x128xf32> to vector<16x16x128xf32>
      %c0_63 = arith.constant 0 : index
      %c0_64 = arith.constant 0 : index
      %c0_65 = arith.constant 0 : index
      %c0_66 = arith.constant 0 : index
      %94 = vector.load %arg9[%c0_63, %c0_64, %c0_65, %c0_66] : memref<1x16x16x128xf32, #tpu.memory_space<vmem>>, vector<1x16x16x128xf32>
      %95 = vector.shape_cast %94 : vector<1x16x16x128xf32> to vector<16x16x128xf32>
      %96 = vector.shape_cast %93 : vector<16x16x128xf32> to vector<1x16x16x128xf32>
      tpu.vector_store %arg9[%c0_63, %c0_64, %c0_65, %c0_66], %96 {strides = array<i32>} : memref<1x16x16x128xf32, #tpu.memory_space<vmem>>, vector<1x16x16x128xf32>,
    } else {
    }
    return
  }
  func.func @transform_0(%arg0: i32, %arg1: i32, %arg2: i32) -> (i32, i32, i32, i32) {
    %c0_i32 = arith.constant 0 : i32
    %c0_i32_0 = arith.constant 0 : i32
    return %arg0, %arg2, %c0_i32, %arg1 : i32, i32, i32, i32
  }
  func.func @transform_1(%arg0: i32, %arg1: i32, %arg2: i32) -> (i32, i32, i32) {
    %c0_i32 = arith.constant 0 : i32
    %c0_i32_0 = arith.constant 0 : i32
    %c0_i32_1 = arith.constant 0 : i32
    return %c0_i32, %arg1, %c0_i32_0 : i32, i32, i32
  }
  func.func @transform_2(%arg0: i32, %arg1: i32, %arg2: i32) -> (i32, i32) {
    %c0_i32 = arith.constant 0 : i32
    %c0_i32_0 = arith.constant 0 : i32
    %c0_i32_1 = arith.constant 0 : i32
    return %c0_i32, %c0_i32_0 : i32, i32
  }
  func.func @transform_3(%arg0: i32, %arg1: i32, %arg2: i32) -> (i32, i32) {
    %c0_i32 = arith.constant 0 : i32
    %c0_i32_0 = arith.constant 0 : i32
    %c0_i32_1 = arith.constant 0 : i32
    return %c0_i32, %c0_i32_0 : i32, i32
  }
  func.func @transform_4(%arg0: i32, %arg1: i32, %arg2: i32) -> (i32, i32) {
    %c0_i32 = arith.constant 0 : i32
    %c0_i32_0 = arith.constant 0 : i32
    %c0_i32_1 = arith.constant 0 : i32
    return %c0_i32, %c0_i32_0 : i32, i32
  }
  func.func @transform_5(%arg0: i32, %arg1: i32, %arg2: i32) -> (i32, i32) {
    %c0_i32 = arith.constant 0 : i32
    %c0_i32_0 = arith.constant 0 : i32
    %c0_i32_1 = arith.constant 0 : i32
    return %c0_i32, %c0_i32_0 : i32, i32
  }
  func.func @transform_6(%arg0: i32, %arg1: i32, %arg2: i32) -> (i32, i32, i32, i32) {
    %c0_i32 = arith.constant 0 : i32
    %c0_i32_0 = arith.constant 0 : i32
    %c0_i32_1 = arith.constant 0 : i32
    %c0_i32_2 = arith.constant 0 : i32
    return %arg0, %c0_i32, %c0_i32_0, %c0_i32_1 : i32, i32, i32, i32
  }
}

</mosaic_0001>

<bundles_post_ra>
// kernel: psp_head_forward.2
= control target key start
LH: loop header
LB: loop body
LE: loop exit
PB: predicated region body
PF: predicated region fallthrough
CT: control target
= control target key end

     0   :  { %v319_v0 = vmov 0.0   ;;  %vm320_vm0 = vmmov 0   ;;  %vm72_vm1 = vcmask 130048   ;;  %s459_s1 = inlined_call_operand.vmem [shape: bf16[16,128], index: 1, kind: input, shape index: {}]   ;;  %s460_s0 = inlined_call_operand.vmem [shape: bf16[104,16], index: 0, kind: input, shape index: {}]   ;;  %s461_s2 = inlined_call_operand.vmem [shape: f32[1,128], index: 2, kind: input, shape index: {}]   ;;  %s462_s3 = inlined_call_operand.vmem [shape: f32[1,128], index: 3, kind: input, shape index: {}]   ;;  %s463_s4 = inlined_call_operand.vmem [shape: f32[104,128], index: 4, kind: output, shape index: {}]  }
   0x1   :  { %277 = vmatprep.subr.bf16.mxu0 %v319_v0  ;;  %v311_v1 = vld [vmem:[%s459_s1] sm:$0xff]   ;;  %279 = vmatprep.mubr.msk.bf16.mxu0 %vm320_vm0, %v319_v0  ;;  %v314_v4 = vld [vmem:[%s460_s0 + $0x8] sm:$0xff]   ;;  %v316_v6 = vld [vmem:[%s460_s0 + $0x10] sm:$0xff]  }
   0x2   :  { %v312_v2 = vld [vmem:[%s460_s0] sm:$0xff]   ;;  %307 = vmatprep.subr.bf16.mxu1 %v319_v0  ;;  %295 = vmatprep.mubr.msk.bf16.mxu1 %vm320_vm0, %v319_v0  ;;  %v315_v5 = vld [vmem:[%s460_s0 + $0x28] sm:$0xff]   ;;  %v317_v7 = vld [vmem:[%s460_s0 + $0x30] ss:$0 sps:$4 sm:$0xff]  }
   0x3   :  { %278 = vmatpush3.bf16.msra.mxu0 %v311_v1  ;;  %308 = vmatpush3.bf16.msra.mxu1 %v311_v1  ;;  %v313_v3 = vld [vmem:[%s460_s0 + $0x20] sm:$0xff]   ;;  %v318_v8 = vld [vmem:[%s460_s0 + $0x18] sm:$0xff]  }
   0x4   :  { %v387_v9 = vld [vmem:[%s461_s2] ss:$0 sm:$0xff] }
   0x5   :  { %v392_v11 = vld [vmem:[%s462_s3] ss:$0 sm:$0xff] }
   0x6   :  { %280 = vmatmul.mubr.msk.bf16.vlgmr.msra.gmra.mrb[0].mxu0 %vm72_vm1, %v312_v2  ;;  %296 = vmatmul.mubr.msk.bf16.vlgmr.msra.gmra.mrb[0].mxu1 %vm72_vm1, %v313_v3 }
   0x7   :  { %283 = vmatprep.mubr.msk.bf16.mxu0 %vm320_vm0, %v319_v0  ;;  %299 = vmatprep.mubr.msk.bf16.mxu1 %vm320_vm0, %v319_v0 }
   0xe   :  { %284 = vmatmul.mubr.msk.bf16.gmra.mrb[4].mxu0 %vm72_vm1, %v314_v4  ;;  %300 = vmatmul.mubr.msk.bf16.gmra.mrb[4].mxu1 %vm72_vm1, %v315_v5 }
   0xf   :  { %287 = vmatprep.mubr.msk.bf16.mxu0 %vm320_vm0, %v319_v0  ;;  %303 = vmatprep.mubr.msk.bf16.mxu1 %vm320_vm0, %v319_v0 }
  0x16   :  { %288 = vmatmul.mubr.msk.bf16.gmra.mrb[8].mxu0 %vm72_vm1, %v316_v6  ;;  %304 = vmatmul.mubr.msk.bf16.gmra.mrb[8].mxu1 %vm72_vm1, %v317_v7 }
  0x17   :  { %291 = vmatprep.mubr.msk.bf16.mxu0 %vm320_vm0, %v319_v0 }
  0x1e   :  { %292 = vmatmul.mubr.msk.bf16.gmra.mrb[12].mxu0 %vm72_vm1, %v318_v8 }
  0xd9   :  { %v128_v10 = vpop.f32.mrb[0].mxu0  ;;  %v160_v12 = vpop.f32.mrb[0].mxu1 }
  0xda   :  { %v189_v13 = vmul.f32 %v387_v9, %v128_v10  ;;  %v281_v14 = vpop.f32.mrb[1].mxu0  ;;  %v197_v15 = vmul.f32 %v387_v9, %v160_v12  ;;  %v297_v16 = vpop.f32.mrb[1].mxu1 }
  0xdb   :  { %v131_v17 = vpop.f32.mrb[2].mxu0  ;;  %v163_v18 = vpop.f32.mrb[2].mxu1 }
  0xdc   :  { %v209_v19 = vadd.f32 %v392_v11, %v189_v13  ;;  %v190_v20 = vmul.f32 %v387_v9, %v131_v17  ;;  %v282_v21 = vpop.f32.mrb[3].mxu0  ;;  %v217_v22 = vadd.f32 %v392_v11, %v197_v15  ;;  %v198_v23 = vmul.f32 %v387_v9, %v163_v18  ;;  %v298_v24 = vpop.f32.mrb[3].mxu1 }
  0xde   :  { %v222_v25 = vmax.f32 %v209_v19, 0.0  ;;  %v210_v26 = vadd.f32 %v392_v11, %v190_v20  ;;  %v230_v27 = vmax.f32 %v217_v22, 0.0  ;;  %v218_v28 = vadd.f32 %v392_v11, %v198_v23 }
  0xe0   :  { %235 = vst [vmem:[%s463_s4] sm:$0xff] %v222_v25  ;;  %v223_v29 = vmax.f32 %v210_v26, 0.0  ;;  %243 = vst [vmem:[%s463_s4 + $0x40] sm:$0xff] %v230_v27  ;;  %v231_v30 = vmax.f32 %v218_v28, 0.0 }
  0xe1   :  { %v136_v31 = vpop.f32.mrb[4].mxu0  ;;  %v168_v32 = vpop.f32.mrb[4].mxu1 }
  0xe2   :  { %236 = vst [vmem:[%s463_s4 + $0x8] sm:$0xff] %v223_v29  ;;  %v191_v33 = vmul.f32 %v387_v9, %v136_v31  ;;  %v285_v34 = vpop.f32.mrb[5].mxu0  ;;  %244 = vst [vmem:[%s463_s4 + $0x48] sm:$0xff] %v231_v30  ;;  %v199_v35 = vmul.f32 %v387_v9, %v168_v32  ;;  %v301_v36 = vpop.f32.mrb[5].mxu1 }
  0xe3   :  { %v139_v37 = vpop.f32.mrb[6].mxu0  ;;  %v171_v38 = vpop.f32.mrb[6].mxu1 }
  0xe4   :  { %v211_v39 = vadd.f32 %v392_v11, %v191_v33  ;;  %v192_v40 = vmul.f32 %v387_v9, %v139_v37  ;;  %v286_v41 = vpop.f32.mrb[7].mxu0  ;;  %v219_v42 = vadd.f32 %v392_v11, %v199_v35  ;;  %v200_v43 = vmul.f32 %v387_v9, %v171_v38  ;;  %v302_v44 = vpop.f32.mrb[7].mxu1 }
  0xe6   :  { %v224_v45 = vmax.f32 %v211_v39, 0.0  ;;  %v212_v46 = vadd.f32 %v392_v11, %v192_v40  ;;  %v232_v47 = vmax.f32 %v219_v42, 0.0  ;;  %v220_v48 = vadd.f32 %v392_v11, %v200_v43 }
  0xe8   :  { %237 = vst [vmem:[%s463_s4 + $0x10] sm:$0xff] %v224_v45  ;;  %v225_v49 = vmax.f32 %v212_v46, 0.0  ;;  %245 = vst [vmem:[%s463_s4 + $0x50] sm:$0xff] %v232_v47  ;;  %v233_v50 = vmax.f32 %v220_v48, 0.0 }
  0xe9   :  { %v144_v51 = vpop.f32.mrb[8].mxu0  ;;  %v176_v52 = vpop.f32.mrb[8].mxu1 }
  0xea   :  { %238 = vst [vmem:[%s463_s4 + $0x18] sm:$0xff] %v225_v49  ;;  %v193_v53 = vmul.f32 %v387_v9, %v144_v51  ;;  %v289_v54 = vpop.f32.mrb[9].mxu0  ;;  %246 = vst [vmem:[%s463_s4 + $0x58] sm:$0xff] %v233_v50  ;;  %v201_v55 = vmul.f32 %v387_v9, %v176_v52  ;;  %v305_v56 = vpop.f32.mrb[9].mxu1 }
  0xeb   :  { %v147_v57 = vpop.f32.mrb[10].mxu0  ;;  %v179_v58 = vpop.f32.mrb[10].mxu1 }
  0xec   :  { %v213_v59 = vadd.f32 %v392_v11, %v193_v53  ;;  %v194_v60 = vmul.f32 %v387_v9, %v147_v57  ;;  %v290_v61 = vpop.f32.mrb[11].mxu0  ;;  %v221_v62 = vadd.f32 %v392_v11, %v201_v55  ;;  %v306_v63 = vpop.f32.mrb[11].mxu1 }
  0xee   :  { %v226_v0 = vmax.f32 %v213_v59, 0.0  ;;  %v214_v1 = vadd.f32 %v392_v11, %v194_v60  ;;  %v234_v2 = vmax.f32 %v221_v62, 0.0 }
  0xf0   :  { %239 = vst [vmem:[%s463_s4 + $0x20] sm:$0xff] %v226_v0  ;;  %v227_v3 = vmax.f32 %v214_v1, 0.0  ;;  %247 = vst [vmem:[%s463_s4 + $0x60] sm:$0xff] %v234_v2 }
  0xf1   :  { %v152_v4 = vpop.f32.mrb[12].mxu0 }
  0xf2   :  { %240 = vst [vmem:[%s463_s4 + $0x28] sm:$0xff] %v227_v3  ;;  %v195_v5 = vmul.f32 %v387_v9, %v152_v4  ;;  %v293_v6 = vpop.f32.mrb[13].mxu0 }
  0xf3   :  { %v155_v7 = vpop.f32.mrb[14].mxu0 }
  0xf4   :  { %v215_v8 = vadd.f32 %v392_v11, %v195_v5  ;;  %v196_v10 = vmul.f32 %v387_v9, %v155_v7  ;;  %v294_v12 = vpop.f32.mrb[15].mxu0 }
  0xf6   :  { %v228_v13 = vmax.f32 %v215_v8, 0.0  ;;  %v216_v14 = vadd.f32 %v392_v11, %v196_v10 }
  0xf8   :  { %241 = vst [vmem:[%s463_s4 + $0x30] sm:$0xff] %v228_v13  ;;  %v229_v15 = vmax.f32 %v216_v14, 0.0 }
  0xfa   :  { %242 = vst [vmem:[%s463_s4 + $0x38] sm:$0xff] %v229_v15 }

// kernel: psp_head_forward.3
= control target key start
LH: loop header
LB: loop body
LE: loop exit
PB: predicated region body
PF: predicated region fallthrough
CT: control target
= control target key end

     0   :  { %s5059_s21 = smov 0   ;;  %s5061_s22 = smov 0   ;;  %s6420_s0 = inlined_call_operand.vmem [shape: bf16[2,16,18,32], index: 0, kind: input, shape index: {}]   ;;  %s6421_s1 = inlined_call_operand.vmem [shape: bf16[9,32,128], index: 1, kind: input, shape index: {}]   ;;  %s6422_s2 = inlined_call_operand.vmem [shape: f32[1,128], index: 2, kind: input, shape index: {}]   ;;  %s6423_s3 = inlined_call_operand.vmem [shape: f32[1,128], index: 3, kind: input, shape index: {}]   ;;  %s6424_s4 = inlined_call_operand.vmem [shape: bf16[128,128], index: 4, kind: input, shape index: {}]   ;;  %s6425_s5 = inlined_call_operand.vmem [shape: f32[1,128], index: 5, kind: input, shape index: {}]   ;;  %s6426_s6 = inlined_call_operand.vmem [shape: f32[2,16,16,128], index: 6, kind: output, shape index: {}]  }
   0x1   :  { %s5063_s23 = smov 0  }
   0x2 LB: > { %s35_s24 = sadd.s32 1, %s5018_s22  ;;  %p3781_p0 = scmp.ge.s32.totalorder %s5022_s23, 1  ;;  %s5022_s23 = sphi %s5063_s23, %s16_s23   ;;  %s5018_s22 = sphi %s5061_s22, %s6592_s22   ;;  %s5014_s21 = sphi %s5059_s21, %s6591_s21  }
   0x3   : > { %p37_p1 = scmp.ge.s32.totalorder %s35_s24, 2  ;;  %p255_p2 = scmp.lt.s32.totalorder %s5022_s23, 3 }
   0x5   : > { %s6594_s24 = smov (%p37_p1, %s35_s24), 0  ;;  %p256_p3 = pnand %p3781_p0, %p255_p2 }
   0x7   : > { %259 = sbr.rel (%p256_p3) target bundleno = 794 (0x31a), region = 44 }
   0xe   : > { %v4958_v0 = vld [vmem:[%s6421_s1] sm:$0xff]   ;;  %p299_p4 = scmp.lt.s32.totalorder %s5014_s21, 1  ;;  %v4959_v1 = vld [vmem:[%s6421_s1 + $0x8] sm:$0xff]   ;;  %v4963_v3 = vld [vmem:[%s6421_s1 + $0x10] sm:$0xff]   ;;  %vm1033_vm0 = vcmask 261120   ;;  %vm849_vm4 = vcmask 1042432  }
   0xf   : > { %4407 = vmatprep.subr.bf16.mxu0 %v4958_v0  ;;  %v4962_v2 = vld [vmem:[%s6421_s1 + $0x20] sm:$0xff]   ;;  %v4964_v4 = vld [vmem:[%s6421_s1 + $0x18] sm:$0xff]   ;;  %4371 = vmatprep.subr.bf16.mxu1 %v4963_v3  ;;  %vm414_vm1 = vsmask.f32 3328  ;;  %vm415_vm2 = vsmask.f32 7440 }
  0x10   : > { %s6596_s21 = smov (!%p299_p4, %s5014_s21), 1  ;;  %4408 = vmatpush3.bf16.msra.mxu0 %v4958_v0  ;;  %4372 = vmatpush3.bf16.msra.mxu1 %v4963_v3  ;;  %v4973_v18 = vld [vmem:[%s6421_s1 + $0x28] sm:$0xff]   ;;  %v5142_v24 = vld [vmem:[%s6421_s1 + $0x40] sm:$0xff]   ;;  %v5183_v45 = vld [vmem:[%s6421_s1 + $0x70] sm:$0xff]   ;;  %vm850_vm5 = vcmask 1046532  }
  0x11   : > { %4409 = vmatprep.subr.bf16.mxu0 %v4959_v1  ;;  %s4933_s9 = smul.u32 192, %s6596_s21  ;;  %4373 = vmatprep.subr.bf16.mxu1 %v4964_v4  ;;  %vm5187_vm3 = vmor %vm414_vm1, %vm415_vm2  ;;  %s4184_s25 = sshll.u32 %s6596_s21, 8 }
  0x12   : > { %vm5539_vm6 = vmor %vm849_vm4, %vm850_vm5  ;;  %s6345_s30 = scalar_lea.vmem %s6426_s6, %s4184_s25 }
  0x13   : > { %s5098_s14 = scalar_lea.vmem %s6420_s0, %s4933_s9 }
  0x14   : > { %4410 = vmatpush3.bf16.msra.mxu0 %v4959_v1  ;;  %v5101_v5 = vld [vmem:[%s5098_s14] sm:$0xf]  ;;  %v5104_v6 = vld [vmem:[%s5098_s14 + $0x4] sm:$0xf]  ;;  %v5107_v7 = vld [vmem:[%s5098_s14 + $0xc] sm:$0xf]  ;;  %4374 = vmatpush3.bf16.msra.mxu1 %v4964_v4 }
  0x15   : > { %v418_v8 = vshrl.u32 %v5101_v5, 16  ;;  %v421_v9 = vshll.u32 %v5101_v5, 16  ;;  %v431_v10 = vshrl.u32 %v5104_v6, 16  ;;  %v5114_v12 = vld [vmem:[%s5098_s14 + $0x10] sm:$0xf]  ;;  %4443 = vmatprep.subr.bf16.mxu0 %v4962_v2  ;;  %v5119_v14 = vcombine.low %v5101_v5, %v5104_v6  ;;  %4479 = vmatprep.subr.bf16.mxu1 %v5142_v24 }
  0x16   : > { %v442_v15 = vshrl.u32 %v5107_v7, 16  ;;  %v445_v16 = vshll.u32 %v5107_v7, 16  ;;  %v5124_v17 = vld [vmem:[%s5098_s14 + $0x18] sm:$0xf]  ;;  %v455_v19 = vshrl.u32 %v5114_v12, 16  ;;  %v6427_v21 = vrot.slane %v5114_v12, 5 }
  0x17   : > { %6496 = vst [vmem:[#allocation3_spill] sm:$0xff] %v5119_v14  ;;  %v5134_v22 = vcombine.low %v5107_v7, %v5114_v12  ;;  %v5137_v23 = vld [vmem:[%s5098_s14 + $0x1c] sm:$0xf]  ;;  %4411 = vmatprep.mubr.msk.bf16.mxu0 %vm1033_vm0, %v5119_v14  ;;  %v466_v25 = vshrl.u32 %v5124_v17, 16  ;;  %v469_v26 = vshll.u32 %v5124_v17, 16  ;;  %v420_v31 = vrot.slane %v418_v8, 4 }
  0x18   : > { %v479_v27 = vshrl.u32 %v5137_v23, 16  ;;  %v5151_v28 = vcombine.low %v5124_v17, %v5137_v23  ;;  %v5154_v29 = vld [vmem:[%s5098_s14 + $0x8] sm:$0x1]  ;;  %v5158_v30 = vrot.slane %v6427_v21, 4  ;;  %v423_v32 = vrot.slane %v421_v9, 5 }
  0x19   : > { %6497 = vst [vmem:[#allocation4_spill] sm:$0xff] %v5134_v22  ;;  %4412 = vmatmul.mubr.msk.bf16.vlgmr.msra.gmra.mrb[0].mxu0 %vm1033_vm0, %v5134_v22  ;;  %v427_v33 = vshll.u32 %v5104_v6, 16  ;;  %v5164_v34 = vld [vmem:[%s5098_s14 + $0x24] sm:$0xf]  ;;  %v433_v35 = vrot.slane %v431_v10, 4  ;;  %v437_v36 = vshll.u32 %v5154_v29, 16 }
  0x1a   : > { %6498 = vst [vmem:[#allocation5_spill] sm:$0xff] %v5151_v28  ;;  %4444 = vmatpush3.bf16.msra.mxu0 %v4962_v2  ;;  %4415 = vmatprep.mubr.msk.bf16.mxu0 %vm1033_vm0, %v5151_v28  ;;  %v5172_v38 = vld [vmem:[%s5098_s14 + $0x28] sm:$0xf]  ;;  %v490_v39 = vshrl.u32 %v5164_v34, 16  ;;  %v424_v40 = vor.u32 %v423_v32, %v420_v31  ;;  %v493_v42 = vshll.u32 %v5164_v34, 16  ;;  %v444_v49 = vrot.slane %v442_v15, 4 }
  0x1b   : > { %v429_v41 = vrot.slane %v427_v33, 5  ;;  %v503_v43 = vshrl.u32 %v5172_v38, 16  ;;  %v5178_v44 = vld [vmem:[%s5098_s14 + $0x14] sm:$0x1]  ;;  %4445 = vmatprep.subr.bf16.mxu0 %v4973_v18  ;;  %v439_v47 = vrot.slane %v437_v36, 5  ;;  %v5193_v48 = vcombine.low %v5164_v34, %v5172_v38 }
  0x1c   : > { %v447_v50 = vrot.slane %v445_v16, 5  ;;  %v5196_v51 = vld [vmem:[%s5098_s14 + $0x30] sm:$0xf]  ;;  %v425_v52 = vrot.slane %v424_v40, 4  ;;  %v451_v54 = vshll.u32 %v5114_v12, 16  ;;  %v457_v55 = vrot.slane %v455_v19, 4 }
  0x1d   : > { %6501 = vst [vmem:[#allocation6_spill] sm:$0xff] %v5193_v48  ;;  %v434_v53 = vor.u32 %v433_v35, %v429_v41  ;;  %v5200_v56 = vld [vmem:[%s5098_s14 + $0x34] sm:$0xf]  ;;  %v461_v58 = vshll.u32 %v5178_v44, 16  ;;  %v514_v60 = vshrl.u32 %v5196_v51, 16  ;;  %v517_v0 = vshll.u32 %v5196_v51, 16 }
  0x1e   : > { %v448_v57 = vor.u32 %v447_v50, %v444_v49  ;;  %4446 = vmatpush3.bf16.msra.mxu0 %v4973_v18  ;;  %v430_v61 = vsel %vm5187_vm3, %v425_v52, %v429_v41  ;;  %v453_v63 = vrot.slane %v451_v54, 5  ;;  %v5209_v1 = vld [vmem:[%s5098_s14 + $0x20] sm:$0x1]  ;;  %v527_v4 = vshrl.u32 %v5200_v56, 16  ;;  %v5218_v9 = vld [vmem:[%s5098_s14 + $0x3c] sm:$0xf] }
  0x1f   : > { %v435_v62 = vrot.slane %v434_v53, 4  ;;  %4587 = vmatprep.subr.bf16.mxu0 %v5183_v45  ;;  %v463_v3 = vrot.slane %v461_v58, 5  ;;  %v5215_v8 = vcombine.low %v5196_v51, %v5200_v56  ;;  %v468_v16 = vrot.slane %v466_v25, 4  ;;  %v5225_v19 = vld [vmem:[%s5098_s14 + $0x40] sm:$0xf] }
  0x20   : > { %v449_v2 = vrot.slane %v448_v57, 4  ;;  %v458_v15 = vor.u32 %v457_v55, %v453_v63  ;;  %v471_v18 = vrot.slane %v469_v26, 5  ;;  %v475_v33 = vshll.u32 %v5137_v23, 16  ;;  %v5237_v26 = vld [vmem:[%s5098_s14 + $0x2c] sm:$0x1] }
  0x21   : > { %6502 = vst [vmem:[#allocation7_spill] sm:$0xff] %v5215_v8  ;;  %v440_v10 = vsel %vm5187_vm3, %v435_v62, %v439_v47  ;;  %4416 = vmatmul.mubr.msk.bf16.gmra.mrb[4].mxu0 %vm1033_vm0, %v5193_v48  ;;  %v481_v35 = vrot.slane %v479_v27, 4  ;;  %v485_v41 = vshll.u32 %v5209_v1, 16  ;;  %v538_v25 = vshrl.u32 %v5218_v9, 16  ;;  %v5248_v52 = vld [vmem:[%s5098_s14 + $0x48] sm:$0xf] }
  0x22   : > { %v5227_v31 = vcombine.low %v430_v61, %v440_v10  ;;  %v454_v32 = vsel %vm5187_vm3, %v449_v2, %v453_v63  ;;  %4419 = vmatprep.mubr.msk.bf16.mxu0 %vm1033_vm0, %v5215_v8  ;;  %v459_v36 = vrot.slane %v458_v15, 4  ;;  %v472_v40 = vor.u32 %v471_v18, %v468_v16  ;;  %v5256_v2 = vld [vmem:[%s5098_s14 + $0x4c] sm:$0xf]  ;;  %v5304_v59 = vld [vmem:[%s5098_s14 + $0x44] sm:$0x1] }
  0x23   : > { %v477_v47 = vrot.slane %v475_v33, 5  ;;  %v541_v49 = vshll.u32 %v5218_v9, 16  ;;  %v551_v50 = vshrl.u32 %v5225_v19, 16  ;;  %v5245_v27 = vcombine.low %v5218_v9, %v5225_v19  ;;  %v4982_v10 = vld [vmem:[%s6421_s1 + $0x48] sm:$0xff]   ;;  %v5311_v21 = vld [vmem:[%s5098_s14 + $0x60] sm:$0xf] }
  0x24   : > { %4375 = vmatprep.mubr.msk.bf16.mxu1 %vm1033_vm0, %v5227_v31  ;;  %v464_v53 = vsel %vm5187_vm3, %v459_v36, %v463_v3  ;;  %v473_v54 = vrot.slane %v472_v40, 4  ;;  %v487_v55 = vrot.slane %v485_v41, 5  ;;  %v492_v57 = vrot.slane %v490_v39, 4  ;;  %6508 = vst [vmem:[#allocation13_spill] sm:$0xff] %v5311_v21  ;;  %v5324_v11 = vld [vmem:[%s5098_s14 + $0x64] sm:$0xf] }
  0x25   : > { %6503 = vst [vmem:[#allocation8_spill] sm:$0xff] %v5245_v27  ;;  %v5252_v58 = vcombine.low %v454_v32, %v464_v53  ;;  %v482_v61 = vor.u32 %v481_v35, %v477_v47  ;;  %v495_v62 = vrot.slane %v493_v42, 5  ;;  %v499_v63 = vshll.u32 %v5172_v38, 16  ;;  %v5271_v35 = vld [vmem:[%s5098_s14 + $0x38] sm:$0x1] }
  0x26   : > { %v478_v3 = vsel %vm5187_vm3, %v473_v54, %v477_v47  ;;  %v505_v39 = vrot.slane %v503_v43, 4  ;;  %v509_v15 = vshll.u32 %v5237_v26, 16  ;;  %v562_v16 = vshrl.u32 %v5248_v52, 16  ;;  %v5281_v47 = vld [vmem:[%s5098_s14 + $0x54] sm:$0xf] }
  0x27   : > { %6504 = vst [vmem:[#allocation9_spill] sm:$0xff] %v5252_v58  ;;  %4376 = vmatmul.mubr.msk.bf16.vlgmr.msra.gmra.mrb[0].mxu1 %vm1033_vm0, %v5252_v58  ;;  %v483_v42 = vrot.slane %v482_v61, 4  ;;  %v496_v18 = vor.u32 %v495_v62, %v492_v57  ;;  %v501_v32 = vrot.slane %v499_v63, 5  ;;  %v565_v33 = vshll.u32 %v5248_v52, 16  ;;  %v5287_v62 = vld [vmem:[%s5098_s14 + $0x58] sm:$0xf] }
  0x28   : > { %v511_v36 = vrot.slane %v509_v15, 5  ;;  %v575_v43 = vshrl.u32 %v5256_v2, 16  ;;  %v5278_v40 = vcombine.low %v5248_v52, %v5256_v2  ;;  %v516_v41 = vrot.slane %v514_v60, 4  ;;  %4480 = vmatpush3.bf16.msra.mxu1 %v5142_v24  ;;  %v5292_v63 = vld [vmem:[%s6421_s1 + $0x30] sm:$0xff]   ;;  %v5370_v48 = vld [vmem:[%s5098_s14 + $0x78] sm:$0xf] }
  0x29   : > { %4420 = vmatmul.mubr.msk.bf16.gmra.mrb[8].mxu0 %vm1033_vm0, %v5245_v27  ;;  %v488_v53 = vsel %vm5187_vm3, %v483_v42, %v487_v55  ;;  %v497_v54 = vrot.slane %v496_v18, 4  ;;  %v506_v57 = vor.u32 %v505_v39, %v501_v32  ;;  %v519_v61 = vrot.slane %v517_v0, 5  ;;  %4481 = vmatprep.subr.bf16.mxu1 %v4982_v10  ;;  %6506 = vst [vmem:[#allocation11_spill] sm:$0xff] %v5292_v63  ;;  %v5385_v14 = vld [vmem:[%s5098_s14 + $0x68] sm:$0x1] }
  0x2a   : > { %6505 = vst [vmem:[#allocation10_spill] sm:$0xff] %v5278_v40  ;;  %v5294_v60 = vcombine.low %v478_v3, %v488_v53  ;;  %4423 = vmatprep.mubr.msk.bf16.mxu0 %vm1033_vm0, %v5278_v40  ;;  %v523_v24 = vshll.u32 %v5200_v56, 16  ;;  %v529_v55 = vrot.slane %v527_v4, 4  ;;  %v533_v39 = vshll.u32 %v5271_v35, 16  ;;  %v5346_v40 = vld [vmem:[%s5098_s14 + $0x6c] sm:$0xf] }
  0x2b   : > { %v502_v0 = vsel %vm5187_vm3, %v497_v54, %v501_v32  ;;  %v507_v15 = vrot.slane %v506_v57, 4  ;;  %v520_v42 = vor.u32 %v519_v61, %v516_v41  ;;  %v586_v18 = vshrl.u32 %v5281_v47, 16  ;;  %6514 = vst [vmem:[#allocation19_spill] sm:$0xff] %v5370_v48  ;;  %6518 = vst [vmem:[#allocation23_spill] sm:$0xff] %v5385_v14  ;;  %v5441_v58 = vld [vmem:[%s5098_s14 + $0x80] sm:$0x1] }
  0x2c   : > { %6507 = vst [vmem:[#allocation12_spill] sm:$0xff] %v5294_v60  ;;  %4379 = vmatprep.mubr.msk.bf16.mxu1 %vm1033_vm0, %v5294_v60  ;;  %v525_v3 = vrot.slane %v523_v24, 5  ;;  %v535_v53 = vrot.slane %v533_v39, 5  ;;  %v589_v20 = vshll.u32 %v5281_v47, 16  ;;  %v599_v4 = vshrl.u32 %v5287_v62, 16  ;;  %4482 = vmatpush3.bf16.msra.mxu1 %v4982_v10  ;;  %6528 = vst [vmem:[#allocation33_spill] sm:$0xff] %v5441_v58 }
  0x2d   : > { %v512_v32 = vsel %vm5187_vm3, %v507_v15, %v511_v36  ;;  %v521_v41 = vrot.slane %v520_v42, 4  ;;  %v5317_v54 = vcombine.low %v5281_v47, %v5287_v62  ;;  %v540_v57 = vrot.slane %v538_v25, 4  ;;  %4515 = vmatprep.subr.bf16.mxu1 %v5292_v63 }
  0x2e   : > { %v5320_v61 = vcombine.low %v502_v0, %v512_v32  ;;  %v530_v24 = vor.u32 %v529_v55, %v525_v3  ;;  %v543_v39 = vrot.slane %v541_v49, 5  ;;  %v547_v37 = vshll.u32 %v5225_v19, 16 }
  0x2f   : > { %6509 = vst [vmem:[#allocation14_spill] sm:$0xff] %v5317_v54  ;;  %v526_v10 = vsel %vm5187_vm3, %v521_v41, %v525_v3  ;;  %v553_v36 = vrot.slane %v551_v50, 4  ;;  %v557_v25 = vshll.u32 %v5304_v59, 16  ;;  %v610_v15 = vshrl.u32 %v5311_v21, 16  ;;  %v5338_v3 = vld [vmem:[%s5098_s14 + $0x50] sm:$0x1] }
  0x30   : > { %6510 = vst [vmem:[#allocation15_spill] sm:$0xff] %v5320_v61  ;;  %4380 = vmatmul.mubr.msk.bf16.gmra.mrb[4].mxu1 %vm1033_vm0, %v5320_v61  ;;  %v531_v49 = vrot.slane %v530_v24, 4  ;;  %v544_v55 = vor.u32 %v543_v39, %v540_v57  ;;  %v549_v0 = vrot.slane %v547_v37, 5  ;;  %v613_v42 = vshll.u32 %v5311_v21, 16 }
  0x31   : > { %4424 = vmatmul.mubr.msk.bf16.gmra.mrb[12].mxu0 %vm1033_vm0, %v5317_v54  ;;  %v559_v32 = vrot.slane %v557_v25, 5  ;;  %v623_v50 = vshrl.u32 %v5324_v11, 16  ;;  %v5343_v41 = vcombine.low %v5311_v21, %v5324_v11  ;;  %v564_v13 = vrot.slane %v562_v16, 4  ;;  %v5351_v54 = vld [vmem:[%s5098_s14 + $0x70] sm:$0xf] }
  0x32   : > { %v536_v24 = vsel %vm5187_vm3, %v531_v49, %v535_v53  ;;  %v545_v57 = vrot.slane %v544_v55, 4  ;;  %v554_v37 = vor.u32 %v553_v36, %v549_v0  ;;  %v567_v39 = vrot.slane %v565_v33, 5  ;;  %6512 = vst [vmem:[#allocation17_spill] sm:$0xff] %v5351_v54  ;;  %v5363_v55 = vld [vmem:[%s5098_s14 + $0x5c] sm:$0x1] }
  0x33   : > { %6511 = vst [vmem:[#allocation16_spill] sm:$0xff] %v5343_v41  ;;  %v5353_v25 = vcombine.low %v526_v10, %v536_v24  ;;  %4427 = vmatprep.mubr.msk.bf16.mxu0 %vm1033_vm0, %v5343_v41  ;;  %v571_v27 = vshll.u32 %v5256_v2, 16  ;;  %v577_v16 = vrot.slane %v575_v43, 4  ;;  %v581_v8 = vshll.u32 %v5338_v3, 16 }
  0x34   : > { %v550_v53 = vsel %vm5187_vm3, %v545_v57, %v549_v0  ;;  %v555_v49 = vrot.slane %v554_v37, 4  ;;  %v568_v36 = vor.u32 %v567_v39, %v564_v13  ;;  %v634_v33 = vshrl.u32 %v5346_v40, 16  ;;  %v5379_v39 = vld [vmem:[%s5098_s14 + $0x7c] sm:$0xf] }
  0x35   : > { %6513 = vst [vmem:[#allocation18_spill] sm:$0xff] %v5353_v25  ;;  %4383 = vmatprep.mubr.msk.bf16.mxu1 %vm1033_vm0, %v5353_v25  ;;  %v573_v10 = vrot.slane %v571_v27, 5  ;;  %v583_v24 = vrot.slane %v581_v8, 5  ;;  %v637_v43 = vshll.u32 %v5346_v40, 16  ;;  %v647_v41 = vshrl.u32 %v5351_v54, 16  ;;  %6516 = vst [vmem:[#allocation21_spill] sm:$0xff] %v5379_v39 }
  0x36   : > { %v560_v13 = vsel %vm5187_vm3, %v555_v49, %v559_v32  ;;  %v569_v0 = vrot.slane %v568_v36, 4  ;;  %v5376_v57 = vcombine.low %v5346_v40, %v5351_v54  ;;  %v588_v37 = vrot.slane %v586_v18, 4 }
  0x37   : > { %v5381_v27 = vcombine.low %v550_v53, %v560_v13  ;;  %v578_v8 = vor.u32 %v577_v16, %v573_v10  ;;  %v591_v28 = vrot.slane %v589_v20, 5  ;;  %v595_v22 = vshll.u32 %v5287_v62, 16  ;;  %v5394_v53 = vld [vmem:[%s5098_s14 + $0x84] sm:$0xf] }
  0x38   : > { %6515 = vst [vmem:[#allocation20_spill] sm:$0xff] %v5376_v57  ;;  %v574_v32 = vsel %vm5187_vm3, %v569_v0, %v573_v10  ;;  %v601_v49 = vrot.slane %v599_v4, 4  ;;  %v605_v18 = vshll.u32 %v5363_v55, 16  ;;  %v658_v36 = vshrl.u32 %v5370_v48, 16  ;;  %6519 = vst [vmem:[#allocation24_spill] sm:$0xff] %v5394_v53 }
  0x39   : > { %6517 = vst [vmem:[#allocation22_spill] sm:$0xff] %v5381_v27  ;;  %4428 = vmatmul.mubr.msk.bf16.gmra.mrb[16].mxu0 %vm1033_vm0, %v5376_v57  ;;  %4384 = vmatmul.mubr.msk.bf16.gmra.mrb[8].mxu1 %vm1033_vm0, %v5381_v27  ;;  %v579_v20 = vrot.slane %v578_v8, 4  ;;  %v592_v16 = vor.u32 %v591_v28, %v588_v37  ;;  %v597_v13 = vrot.slane %v595_v22, 5  ;;  %v661_v25 = vshll.u32 %v5370_v48, 16  ;;  %v5400_v10 = vld [vmem:[%s5098_s14 + $0x88] sm:$0xf] }
  0x3a   : > { %6520 = vst [vmem:[#allocation25_spill] sm:$0xff] %v5400_v10  ;;  %v607_v0 = vrot.slane %v605_v18, 5  ;;  %v671_v4 = vshrl.u32 %v5379_v39, 16  ;;  %v5405_v57 = vcombine.low %v5370_v48, %v5379_v39  ;;  %v612_v61 = vrot.slane %v610_v15, 4  ;;  %v5416_v48 = vld [vmem:[%s5098_s14 + $0x74] sm:$0x1] }
  0x3b   : > { %v584_v27 = vsel %vm5187_vm3, %v579_v20, %v583_v24  ;;  %v593_v8 = vrot.slane %v592_v16, 4  ;;  %v602_v28 = vor.u32 %v601_v49, %v597_v13  ;;  %v615_v22 = vrot.slane %v613_v42, 5  ;;  %6523 = vst [vmem:[#allocation28_spill] sm:$0xff] %v5416_v48  ;;  %v5419_v15 = vld [vmem:[%s5098_s14 + $0x90] sm:$0xf] }
  0x3c   : > { %6521 = vst [vmem:[#allocation26_spill] sm:$0xff] %v5405_v57  ;;  %v5409_v37 = vcombine.low %v574_v32, %v584_v27  ;;  %4431 = vmatprep.mubr.msk.bf16.mxu0 %vm1033_vm0, %v5405_v57  ;;  %v619_v18 = vshll.u32 %v5324_v11, 16  ;;  %v625_v63 = vrot.slane %v623_v50, 4  ;;  %v629_v60 = vshll.u32 %v5385_v14, 16  ;;  %6524 = vst [vmem:[#allocation29_spill] sm:$0xff] %v5419_v15 }
  0x3d   : > { %v598_v24 = vsel %vm5187_vm3, %v593_v8, %v597_v13  ;;  %v603_v49 = vrot.slane %v602_v28, 4  ;;  %v616_v42 = vor.u32 %v615_v22, %v612_v61  ;;  %v682_v27 = vshrl.u32 %v5394_v53, 16  ;;  %v5429_v57 = vld [vmem:[%s5098_s14 + $0x94] sm:$0xf] }
  0x3e   : > { %6522 = vst [vmem:[#allocation27_spill] sm:$0xff] %v5409_v37  ;;  %4387 = vmatprep.mubr.msk.bf16.mxu1 %vm1033_vm0, %v5409_v37  ;;  %v621_v32 = vrot.slane %v619_v18, 5  ;;  %v631_v20 = vrot.slane %v629_v60, 5  ;;  %v685_v50 = vshll.u32 %v5394_v53, 16  ;;  %v695_v16 = vshrl.u32 %v5400_v10, 16  ;;  %6525 = vst [vmem:[#allocation30_spill] sm:$0xff] %v5429_v57 }
  0x3f   : > { %v608_v13 = vsel %vm5187_vm3, %v603_v49, %v607_v0  ;;  %v617_v8 = vrot.slane %v616_v42, 4  ;;  %v5435_v61 = vcombine.low %v5394_v53, %v5400_v10  ;;  %v636_v28 = vrot.slane %v634_v33, 4 }
  0x40   : > { %v5437_v22 = vcombine.low %v598_v24, %v608_v13  ;;  %v626_v60 = vor.u32 %v625_v63, %v621_v32  ;;  %v639_v18 = vrot.slane %v637_v43, 5  ;;  %v643_v37 = vshll.u32 %v5351_v54, 16  ;;  %v5450_v24 = vld [vmem:[%s5098_s14 + $0x9c] sm:$0xf]  ;;  %v5528_v54 = vld [vmem:[%s5098_s14 + $0xa4] sm:$0x1] }
  0x41   : > { %6526 = vst [vmem:[#allocation31_spill] sm:$0xff] %v5435_v61  ;;  %v622_v14 = vsel %vm5187_vm3, %v617_v8, %v621_v32  ;;  %4432 = vmatmul.mubr.msk.bf16.gmra.mrb[20].mxu0 %vm1033_vm0, %v5435_v61  ;;  %v649_v0 = vrot.slane %v647_v41, 4  ;;  %v653_v49 = vshll.u32 %v5416_v48, 16  ;;  %v706_v33 = vshrl.u32 %v5419_v15, 16  ;;  %6529 = vst [vmem:[#allocation34_spill] sm:$0xff] %v5450_v24 }
  0x42   : > { %6527 = vst [vmem:[#allocation32_spill] sm:$0xff] %v5437_v22  ;;  %4388 = vmatmul.mubr.msk.bf16.gmra.mrb[12].mxu1 %vm1033_vm0, %v5437_v22  ;;  %v627_v63 = vrot.slane %v626_v60, 4  ;;  %v640_v43 = vor.u32 %v639_v18, %v636_v28  ;;  %v645_v42 = vrot.slane %v643_v37, 5  ;;  %v709_v13 = vshll.u32 %v5419_v15, 16  ;;  %v5456_v32 = vld [vmem:[%s5098_s14 + $0xa0] sm:$0xf] }
  0x43   : > { %v655_v8 = vrot.slane %v653_v49, 5  ;;  %v719_v41 = vshrl.u32 %v5429_v57, 16  ;;  %v5461_v61 = vcombine.low %v5419_v15, %v5429_v57  ;;  %v660_v53 = vrot.slane %v658_v36, 4  ;;  %v5472_v15 = vld [vmem:[%s5098_s14 + $0x8c] sm:$0x1] }
  0x44   : > { %v632_v22 = vsel %vm5187_vm3, %v627_v63, %v631_v20  ;;  %v641_v60 = vrot.slane %v640_v43, 4  ;;  %v650_v28 = vor.u32 %v649_v0, %v645_v42  ;;  %v663_v37 = vrot.slane %v661_v25, 5  ;;  %6532 = vst [vmem:[#allocation37_spill] sm:$0xff] %v5472_v15  ;;  %v5475_v36 = vld [vmem:[%s5098_s14 + $0xa8] sm:$0xf] }
  0x45   : > { %6530 = vst [vmem:[#allocation35_spill] sm:$0xff] %v5461_v61  ;;  %v5465_v18 = vcombine.low %v622_v14, %v632_v22  ;;  %4435 = vmatprep.mubr.msk.bf16.mxu0 %vm1033_vm0, %v5461_v61  ;;  %v667_v49 = vshll.u32 %v5379_v39, 16  ;;  %v673_v48 = vrot.slane %v671_v4, 4  ;;  %v677_v21 = vshll.u32 %v5441_v58, 16  ;;  %6533 = vst [vmem:[#allocation38_spill] sm:$0xff] %v5475_v36 }
  0x46   : > { %v646_v25 = vsel %vm5187_vm3, %v641_v60, %v645_v42  ;;  %v651_v14 = vrot.slane %v650_v28, 4  ;;  %v664_v20 = vor.u32 %v663_v37, %v660_v53  ;;  %v730_v22 = vshrl.u32 %v5450_v24, 16  ;;  %v5485_v61 = vld [vmem:[%s5098_s14 + $0xac] sm:$0xf]  ;;  %v5497_v58 = vld [vmem:[%s5098_s14 + $0x98] sm:$0x1] }
  0x47   : > { %6531 = vst [vmem:[#allocation36_spill] sm:$0xff] %v5465_v18  ;;  %4391 = vmatprep.mubr.msk.bf16.mxu1 %vm1033_vm0, %v5465_v18  ;;  %v669_v4 = vrot.slane %v667_v49, 5  ;;  %v679_v0 = vrot.slane %v677_v21, 5  ;;  %v733_v63 = vshll.u32 %v5450_v24, 16  ;;  %v743_v43 = vshrl.u32 %v5456_v32, 16  ;;  %6536 = vst [vmem:[#allocation41_spill] sm:$0xff] %v5497_v58 }
  0x48   : > { %v656_v42 = vsel %vm5187_vm3, %v651_v14, %v655_v8  ;;  %v665_v60 = vrot.slane %v664_v20, 4  ;;  %v5491_v53 = vcombine.low %v5450_v24, %v5456_v32  ;;  %v684_v28 = vrot.slane %v682_v27, 4 }
  0x49   : > { %v5493_v37 = vcombine.low %v646_v25, %v656_v42  ;;  %v674_v21 = vor.u32 %v673_v48, %v669_v4  ;;  %v687_v49 = vrot.slane %v685_v50, 5  ;;  %v691_v18 = vshll.u32 %v5400_v10, 16  ;;  %v5506_v25 = vld [vmem:[%s5098_s14 + $0xb4] sm:$0xf] }
  0x4a   : > { %6534 = vst [vmem:[#allocation39_spill] sm:$0xff] %v5491_v53  ;;  %v670_v39 = vsel %vm5187_vm3, %v665_v60, %v669_v4  ;;  %4436 = vmatmul.mubr.msk.bf16.gmra.mrb[24].mxu0 %vm1033_vm0, %v5491_v53  ;;  %v697_v8 = vrot.slane %v695_v16, 4  ;;  %v701_v14 = vshll.u32 %v5472_v15, 16  ;;  %v754_v27 = vshrl.u32 %v5475_v36, 16  ;;  %v5512_v4 = vld [vmem:[%s5098_s14 + $0xb8] sm:$0xf] }
  0x4b   : > { %6535 = vst [vmem:[#allocation40_spill] sm:$0xff] %v5493_v37  ;;  %4392 = vmatmul.mubr.msk.bf16.gmra.mrb[16].mxu1 %vm1033_vm0, %v5493_v37  ;;  %v675_v48 = vrot.slane %v674_v21, 4  ;;  %v688_v50 = vor.u32 %v687_v49, %v684_v28  ;;  %v693_v20 = vrot.slane %v691_v18, 5  ;;  %v757_v42 = vshll.u32 %v5475_v36, 16 }
  0x4c   : > { %v703_v60 = vrot.slane %v701_v14, 5  ;;  %v767_v16 = vshrl.u32 %v5485_v61, 16  ;;  %v5517_v53 = vcombine.low %v5475_v36, %v5485_v61  ;;  %v708_v24 = vrot.slane %v706_v33, 4 }
  0x4d   : > { %v680_v15 = vsel %vm5187_vm3, %v675_v48, %v679_v0  ;;  %v689_v37 = vrot.slane %v688_v50, 4  ;;  %v698_v21 = vor.u32 %v697_v8, %v693_v20  ;;  %v711_v28 = vrot.slane %v709_v13, 5  ;;  %v4987_v48 = vld [vmem:[%s6421_s1 + $0x68] sm:$0xff]  }
  0x4e   : > { %6537 = vst [vmem:[#allocation42_spill] sm:$0xff] %v5517_v53  ;;  %v5521_v18 = vcombine.low %v670_v39, %v680_v15  ;;  %4439 = vmatprep.mubr.msk.bf16.mxu0 %vm1033_vm0, %v5517_v53  ;;  %v715_v49 = vshll.u32 %v5429_v57, 16  ;;  %v721_v14 = vrot.slane %v719_v41, 4  ;;  %v725_v10 = vshll.u32 %v5497_v58, 16 }
  0x4f   : > { %v694_v33 = vsel %vm5187_vm3, %v689_v37, %v693_v20  ;;  %v699_v36 = vrot.slane %v698_v21, 4  ;;  %v712_v0 = vor.u32 %v711_v28, %v708_v24  ;;  %v778_v8 = vshrl.u32 %v5506_v25, 16 }
  0x50   : > { %6538 = vst [vmem:[#allocation43_spill] sm:$0xff] %v5521_v18  ;;  %4395 = vmatprep.mubr.msk.bf16.mxu1 %vm1033_vm0, %v5521_v18  ;;  %v717_v39 = vrot.slane %v715_v49, 5  ;;  %v727_v15 = vrot.slane %v725_v10, 5  ;;  %v781_v13 = vshll.u32 %v5506_v25, 16  ;;  %v791_v41 = vshrl.u32 %v5512_v4, 16 }
  0x51   : > { %v704_v24 = vsel %vm5187_vm3, %v699_v36, %v703_v60  ;;  %v713_v37 = vrot.slane %v712_v0, 4  ;;  %v5547_v50 = vcombine.low %v5506_v25, %v5512_v4  ;;  %v732_v20 = vrot.slane %v730_v22, 4 }
  0x52   : > { %v5549_v10 = vcombine.low %v694_v33, %v704_v24  ;;  %v722_v21 = vor.u32 %v721_v14, %v717_v39  ;;  %v735_v28 = vrot.slane %v733_v63, 5  ;;  %v739_v49 = vshll.u32 %v5456_v32, 16 }
  0x53   : > { %6541 = vst [vmem:[#allocation44_spill] sm:$0xff] %v5547_v50  ;;  %v718_v53 = vsel %vm5187_vm3, %v713_v37, %v717_v39  ;;  %4440 = vmatmul.mubr.msk.bf16.gmra.mrb[28].mxu0 %vm1033_vm0, %v5547_v50  ;;  %v745_v36 = vrot.slane %v743_v43, 4  ;;  %v749_v60 = vshll.u32 %v5528_v54, 16  ;;  %v6542_v0 = vrot.slane %v5104_v6, 5  ;;  %v5568_v43 = vld [vmem:[%s5098_s14 + $0xb0] sm:$0x1] }
  0x54   : > { %v6543_v22 = vrot.slane %v5101_v5, 9  ;;  %4396 = vmatmul.mubr.msk.bf16.gmra.mrb[20].mxu1 %vm1033_vm0, %v5549_v10  ;;  %v723_v63 = vrot.slane %v722_v21, 4  ;;  %v736_v14 = vor.u32 %v735_v28, %v732_v20  ;;  %v741_v24 = vrot.slane %v739_v49, 5 }
  0x55   : > { %v6544_v39 = vmov %v6542_v0  ;;  %v751_v50 = vrot.slane %v749_v60, 5  ;;  %v756_v18 = vrot.slane %v754_v27, 4  ;;  %v759_v58 = vrot.slane %v757_v42, 5 }
  0x56   : > { %v855_v33 = vsel %vm5539_vm6, %v6543_v22, %v6542_v0  ;;  %v856_v37 = vrot.slane %v6544_v39, 4  ;;  %v763_v57 = vshll.u32 %v5485_v61, 16  ;;  %v728_v5 = vsel %vm5187_vm3, %v723_v63, %v727_v15 }
  0x57   : > { %v737_v0 = vrot.slane %v736_v14, 4  ;;  %v746_v22 = vor.u32 %v745_v36, %v741_v24  ;;  %v6545_v21 = vrot.slane %v5154_v29, 5  ;;  %v5577_v6 = vcombine.low %v718_v53, %v728_v5 }
  0x58   : > { %v760_v49 = vor.u32 %v759_v58, %v756_v18  ;;  %v765_v27 = vrot.slane %v763_v57, 5  ;;  %v769_v39 = vrot.slane %v767_v16, 4  ;;  %v773_v15 = vshll.u32 %v5568_v43, 16  ;;  %v5600_v18 = vld [vmem:[%s5098_s14 + $0xbc] sm:$0x1] }
  0x59   : > { %v858_v20 = vsel %vm5539_vm6, %v856_v37, %v6545_v21  ;;  %v742_v42 = vsel %vm5187_vm3, %v737_v0, %v741_v24  ;;  %v747_v60 = vrot.slane %v746_v22, 4  ;;  %4399 = vmatprep.mubr.msk.bf16.mxu1 %vm1033_vm0, %v5577_v6  ;;  %v6546_v53 = vrot.slane %v5114_v12, 5 }
  0x5a   : > { %v5579_v28 = vcombine.low %v855_v33, %v858_v20  ;;  %v761_v29 = vrot.slane %v760_v49, 4  ;;  %v6547_v36 = vrot.slane %v5107_v7, 9  ;;  %v6548_v57 = vrot.slane %v5178_v44, 5  ;;  %v4983_v7 = vld [vmem:[%s6421_s1 + $0x78] sm:$0xff]  }
  0x5b   : > { %v780_v33 = vrot.slane %v778_v8, 4  ;;  %v752_v63 = vsel %vm5187_vm3, %v747_v60, %v751_v50  ;;  %v770_v14 = vor.u32 %v769_v39, %v765_v27  ;;  %v775_v24 = vrot.slane %v773_v15, 5 }
  0x5c   : > { %4447 = vmatprep.mubr.msk.bf16.mxu0 %vm1033_vm0, %v5579_v28  ;;  %v862_v58 = vsel %vm5539_vm6, %v6547_v36, %v6546_v53  ;;  %v865_v16 = vsel %vm5539_vm6, %v5158_v30, %v6548_v57  ;;  %v5609_v37 = vcombine.low %v742_v42, %v752_v63  ;;  %v766_v44 = vsel %vm5187_vm3, %v761_v29, %v765_v27 }
  0x5d   : > { %v5604_v12 = vcombine.low %v862_v58, %v865_v16  ;;  %v783_v30 = vrot.slane %v781_v13, 5  ;;  %v787_v5 = vshll.u32 %v5512_v4, 16  ;;  %v771_v8 = vrot.slane %v770_v14, 4 }
  0x5e   : > { %v793_v50 = vrot.slane %v791_v41, 4  ;;  %v797_v0 = vshll.u32 %v5600_v18, 16  ;;  %v3787_v22 = vrot.slane %v5124_v17, 9  ;;  %4400 = vmatmul.mubr.msk.bf16.gmra.mrb[24].mxu1 %vm1033_vm0, %v5609_v37  ;;  %v868_v13 = vrot.slane %v5137_v23, 5  ;;  %v5630_v17 = vld [vmem:[%s6421_s1 + $0x60] sm:$0xff]  }
  0x5f   : > { %4448 = vmatmul.mubr.msk.bf16.vlgmr.msra.gmra.mrb[0].mxu0 %vm1033_vm0, %v5604_v12  ;;  %v784_v21 = vor.u32 %v783_v30, %v780_v33  ;;  %v789_v20 = vrot.slane %v787_v5, 5  ;;  %v871_v49 = vrot.slane %v5209_v1, 5  ;;  %v776_v27 = vsel %vm5187_vm3, %v771_v8, %v775_v24 }
  0x60   : > { %4588 = vmatpush3.bf16.msra.mxu0 %v5183_v45  ;;  %v799_v42 = vrot.slane %v797_v0, 5  ;;  %v3788_v41 = vrot.slane %v5164_v34, 9  ;;  %v875_v60 = vrot.slane %v5172_v38, 5  ;;  %v5632_v39 = vcombine.low %v766_v44, %v776_v27 }
  0x61   : > { %4589 = vmatprep.subr.bf16.mxu0 %v4983_v7  ;;  %v785_v45 = vrot.slane %v784_v21, 4  ;;  %v794_v23 = vor.u32 %v793_v50, %v789_v20  ;;  %v869_v1 = vsel %vm5539_vm6, %v3787_v22, %v868_v13  ;;  %v870_v15 = vrot.slane %v868_v13, 4 }
  0x62   : > { %v876_v29 = vsel %vm5539_vm6, %v3788_v41, %v875_v60  ;;  %v877_v34 = vrot.slane %v875_v60, 4  ;;  %v878_v38 = vrot.slane %v5237_v26, 5  ;;  %4403 = vmatprep.mubr.msk.bf16.mxu1 %vm1033_vm0, %v5632_v39  ;;  %v3789_v58 = vrot.slane %v5196_v51, 9  ;;  %v6549_v41 = vld [vmem:[#allocation17_spill] sm:$0xff] }
  0x63   : > { %v790_v53 = vsel %vm5187_vm3, %v785_v45, %v789_v20  ;;  %v795_v36 = vrot.slane %v794_v23, 4  ;;  %v882_v57 = vrot.slane %v5200_v56, 5  ;;  %v872_v16 = vsel %vm5539_vm6, %v870_v15, %v871_v49  ;;  %v6550_v23 = vld [vmem:[#allocation13_spill] sm:$0xff]  ;;  %v6551_v15 = vld [vmem:[#allocation28_spill] sm:$0xff] }
  0x64   : > { %4590 = vmatpush3.bf16.msra.mxu0 %v4983_v7  ;;  %v879_v33 = vsel %vm5539_vm6, %v877_v34, %v878_v38  ;;  %v885_v26 = vrot.slane %v5271_v35, 5  ;;  %v3790_v63 = vrot.slane %v5218_v9, 9  ;;  %v5654_v24 = vcombine.low %v869_v1, %v872_v16  ;;  %v6552_v38 = vld [vmem:[#allocation23_spill] sm:$0xff]  ;;  %v6554_v16 = vld [vmem:[#allocation25_spill] sm:$0xff] }
  0x65   : > { %4623 = vmatprep.subr.bf16.mxu0 %v5630_v17  ;;  %v800_v14 = vsel %vm5187_vm3, %v795_v36, %v799_v42  ;;  %v5656_v51 = vcombine.low %v876_v29, %v879_v33  ;;  %v883_v56 = vsel %vm5539_vm6, %v3789_v58, %v882_v57  ;;  %v884_v44 = vrot.slane %v882_v57, 4  ;;  %v6553_v58 = vld [vmem:[#allocation24_spill] sm:$0xff] }
  0x66   : > { %v5660_v7 = vcombine.low %v790_v53, %v800_v14  ;;  %v889_v30 = vrot.slane %v5225_v19, 5  ;;  %v892_v35 = vrot.slane %v5304_v59, 5  ;;  %4451 = vmatprep.mubr.msk.bf16.mxu0 %vm1033_vm0, %v5654_v24  ;;  %v3791_v46 = vrot.slane %v5248_v52, 9  ;;  %v6556_v14 = vld [vmem:[#allocation12_spill] sm:$0xff] }
  0x67   : > { %v896_v9 = vrot.slane %v5256_v2, 5  ;;  %v899_v5 = vrot.slane %v5338_v3, 5  ;;  %v3792_v8 = vrot.slane %v5281_v47, 9  ;;  %4452 = vmatmul.mubr.msk.bf16.gmra.mrb[4].mxu0 %vm1033_vm0, %v5656_v51  ;;  %v886_v59 = vsel %vm5539_vm6, %v884_v44, %v885_v26  ;;  %v6555_v26 = vld [vmem:[#allocation9_spill] sm:$0xff] }
  0x68   : > { %4404 = vmatmul.mubr.msk.bf16.gmra.mrb[28].mxu1 %vm1033_vm0, %v5660_v7  ;;  %v890_v19 = vsel %vm5539_vm6, %v3790_v63, %v889_v30  ;;  %v891_v50 = vrot.slane %v889_v30, 4  ;;  %v903_v52 = vrot.slane %v5287_v62, 5  ;;  %v5681_v2 = vcombine.low %v883_v56, %v886_v59 }
  0x69   : > { %4483 = vmatprep.mubr.msk.bf16.mxu1 %vm1033_vm0, %v5227_v31  ;;  %v897_v47 = vsel %vm5539_vm6, %v3791_v46, %v896_v9  ;;  %v898_v3 = vrot.slane %v896_v9, 4  ;;  %v906_v0 = vrot.slane %v5363_v55, 5  ;;  %v910_v49 = vrot.slane %v5324_v11, 5 }
  0x6a   : > { %v893_v22 = vsel %vm5539_vm6, %v891_v50, %v892_v35  ;;  %v904_v21 = vsel %vm5539_vm6, %v3792_v8, %v903_v52  ;;  %v905_v20 = vrot.slane %v903_v52, 4  ;;  %4455 = vmatprep.mubr.msk.bf16.mxu0 %vm1033_vm0, %v5681_v2  ;;  %v3794_v42 = vrot.slane %v5346_v40, 9  ;;  %v4986_v40 = vld [vmem:[%s6421_s1 + $0x38] sm:$0xff]   ;;  %v6557_v35 = vld [vmem:[#allocation37_spill] sm:$0xff] }
  0x6b   : > { %v5692_v62 = vcombine.low %v890_v19, %v893_v22  ;;  %v900_v13 = vsel %vm5539_vm6, %v898_v3, %v899_v5  ;;  %v917_v60 = vrot.slane %v6549_v41, 5  ;;  %v3793_v1 = vrot.slane %v6550_v23, 9  ;;  %v6558_v8 = vld [vmem:[#allocation21_spill] sm:$0xff]  ;;  %v6559_v19 = vld [vmem:[#allocation11_spill] sm:$0xff]  ;;  %v6560_v52 = vld [vmem:[#allocation34_spill] sm:$0xff] }
  0x6c   : > { %v5697_v27 = vcombine.low %v897_v47, %v900_v13  ;;  %v907_v55 = vsel %vm5539_vm6, %v905_v20, %v906_v0  ;;  %v920_v29 = vrot.slane %v6551_v15, 5  ;;  %v912_v34 = vrot.slane %v910_v49, 4  ;;  %v5743_v0 = vld [vmem:[%s6421_s1 + $0x50] sm:$0xff]   ;;  %v6561_v13 = vld [vmem:[#allocation19_spill] sm:$0xff] }
  0x6d   : > { %v5703_v45 = vcombine.low %v904_v21, %v907_v55  ;;  %v913_v53 = vrot.slane %v6552_v38, 5  ;;  %v918_v11 = vsel %vm5539_vm6, %v3794_v42, %v917_v60  ;;  %v919_v36 = vrot.slane %v917_v60, 4  ;;  %v6564_v38 = vld [vmem:[#allocation18_spill] sm:$0xff] }
  0x6e   : > { %v3796_v57 = vrot.slane %v6553_v58, 9  ;;  %v931_v33 = vrot.slane %v6554_v16, 5  ;;  %v934_v46 = vrot.slane %v6557_v35, 5  ;;  %v911_v9 = vsel %vm5539_vm6, %v3793_v1, %v910_v49  ;;  %v6568_v35 = vld [vmem:[#allocation22_spill] sm:$0xff] }
  0x6f   : > { %4456 = vmatmul.mubr.msk.bf16.gmra.mrb[8].mxu0 %vm1033_vm0, %v5692_v62  ;;  %v921_v63 = vsel %vm5539_vm6, %v919_v36, %v920_v29  ;;  %v914_v5 = vsel %vm5539_vm6, %v912_v34, %v913_v53  ;;  %v924_v59 = vrot.slane %v6558_v8, 5  ;;  %v3798_v47 = vrot.slane %v6560_v52, 9  ;;  %v6565_v36 = vld [vmem:[#allocation30_spill] sm:$0xff] }
  0x70   : > { %4484 = vmatmul.mubr.msk.bf16.vlgmr.msra.gmra.mrb[32].mxu1 %vm1033_vm0, %v6555_v26  ;;  %4459 = vmatprep.mubr.msk.bf16.mxu0 %vm1033_vm0, %v5697_v27  ;;  %v5725_v56 = vcombine.low %v918_v11, %v921_v63  ;;  %v932_v44 = vsel %vm5539_vm6, %v3796_v57, %v931_v33  ;;  %v933_v30 = vrot.slane %v931_v33, 4  ;;  %v945_v3 = vrot.slane %v5456_v32, 5  ;;  %v6562_v32 = vld [vmem:[#allocation33_spill] sm:$0xff] }
  0x71   : > { %4487 = vmatprep.mubr.msk.bf16.mxu1 %vm1033_vm0, %v6556_v14  ;;  %4516 = vmatpush3.bf16.msra.mxu1 %v6559_v19  ;;  %v948_v21 = vrot.slane %v5528_v54, 5  ;;  %v5748_v20 = vcombine.low %v911_v9, %v914_v5  ;;  %v3795_v49 = vrot.slane %v6561_v13, 9  ;;  %v926_v41 = vrot.slane %v924_v59, 4  ;;  %v6563_v54 = vld [vmem:[#allocation15_spill] sm:$0xff]  ;;  %v6566_v33 = vld [vmem:[#allocation29_spill] sm:$0xff]  ;;  %v6570_v19 = vld [vmem:[#allocation38_spill] sm:$0xff] }
  0x72   : > { %v935_v50 = vsel %vm5539_vm6, %v933_v30, %v934_v46  ;;  %4517 = vmatprep.subr.bf16.mxu1 %v4986_v40  ;;  %v946_v55 = vsel %vm5539_vm6, %v3798_v47, %v945_v3  ;;  %v947_v42 = vrot.slane %v945_v3, 4  ;;  %v927_v60 = vrot.slane %v6562_v32, 5  ;;  %v6569_v46 = vld [vmem:[#allocation27_spill] sm:$0xff]  ;;  %v6571_v3 = vld [vmem:[#allocation32_spill] sm:$0xff] }
  0x73   : > { %v5745_v22 = vcombine.low %v932_v44, %v935_v50  ;;  %v3800_v23 = vrot.slane %v5506_v25, 9  ;;  %v959_v1 = vrot.slane %v5512_v4, 5  ;;  %v962_v4 = vrot.slane %v5600_v18, 5  ;;  %v6567_v44 = vld [vmem:[#allocation41_spill] sm:$0xff]  ;;  %v6579_v32 = vld [vmem:[#allocation7_spill] sm:$0xff] }
  0x74   : > { %v949_v15 = vsel %vm5539_vm6, %v947_v42, %v948_v21  ;;  %v925_v53 = vsel %vm5539_vm6, %v3795_v49, %v924_v59  ;;  %v928_v11 = vsel %vm5539_vm6, %v926_v41, %v927_v60  ;;  %v938_v58 = vrot.slane %v6565_v36, 5  ;;  %v6572_v21 = vld [vmem:[#allocation36_spill] sm:$0xff]  ;;  %v6577_v42 = vld [vmem:[#allocation5_spill] sm:$0xff]  ;;  %v6578_v41 = vld [vmem:[#allocation6_spill] sm:$0xff] }
  0x75   : > { %4518 = vmatpush3.bf16.msra.mxu1 %v4986_v40  ;;  %v5763_v29 = vcombine.low %v946_v55, %v949_v15  ;;  %v960_v34 = vsel %vm5539_vm6, %v3800_v23, %v959_v1  ;;  %v961_v25 = vrot.slane %v959_v1, 4  ;;  %v5781_v18 = vcombine.low %v925_v53, %v928_v11  ;;  %v6574_v55 = vld [vmem:[#allocation43_spill] sm:$0xff]  ;;  %v6580_v60 = vld [vmem:[#allocation8_spill] sm:$0xff]  ;;  %v6582_v23 = vld [vmem:[#allocation14_spill] sm:$0xff] }
  0x76   : > { %4551 = vmatprep.subr.bf16.mxu1 %v5743_v0  ;;  %v3797_v40 = vrot.slane %v6566_v33, 9  ;;  %v940_v63 = vrot.slane %v938_v58, 4  ;;  %v941_v30 = vrot.slane %v6567_v44, 5  ;;  %v952_v8 = vrot.slane %v5485_v61, 5  ;;  %v6583_v1 = vld [vmem:[#allocation16_spill] sm:$0xff] }
  0x77   : > { %4460 = vmatmul.mubr.msk.bf16.gmra.mrb[12].mxu0 %vm1033_vm0, %v5703_v45  ;;  %v963_v57 = vsel %vm5539_vm6, %v961_v25, %v962_v4  ;;  %v3799_v50 = vrot.slane %v6570_v19, 9  ;;  %v955_v47 = vrot.slane %v5568_v43, 5  ;;  %v6573_v43 = vld [vmem:[#allocation40_spill] sm:$0xff] }
  0x78   : > { %4488 = vmatmul.mubr.msk.bf16.gmra.mrb[36].mxu1 %vm1033_vm0, %v6563_v54  ;;  %4463 = vmatprep.mubr.msk.bf16.mxu0 %vm1033_vm0, %v5748_v20  ;;  %v5779_v16 = vcombine.low %v960_v34, %v963_v57  ;;  %v939_v9 = vsel %vm5539_vm6, %v3797_v40, %v938_v58  ;;  %v942_v5 = vsel %vm5539_vm6, %v940_v63, %v941_v30  ;;  %v954_v52 = vrot.slane %v952_v8, 4  ;;  %v6584_v15 = vld [vmem:[#allocation20_spill] sm:$0xff]  ;;  %v6586_v34 = vld [vmem:[#allocation31_spill] sm:$0xff] }
  0x79   : > { %4491 = vmatprep.mubr.msk.bf16.mxu1 %vm1033_vm0, %v6564_v38  ;;  %v5798_v59 = vcombine.low %v939_v9, %v942_v5  ;;  %v953_v61 = vsel %vm5539_vm6, %v3799_v50, %v952_v8 }
  0x7a   : > { %v956_v13 = vsel %vm5539_vm6, %v954_v52, %v955_v47 }
  0x7b   : > { %v5814_v49 = vcombine.low %v953_v61, %v956_v13 }
  0x7f   : > { %4464 = vmatmul.mubr.msk.bf16.gmra.mrb[16].mxu0 %vm1033_vm0, %v5725_v56 }
  0x80   : > { %4492 = vmatmul.mubr.msk.bf16.gmra.mrb[40].mxu1 %vm1033_vm0, %v6568_v35  ;;  %4467 = vmatprep.mubr.msk.bf16.mxu0 %vm1033_vm0, %v5781_v18 }
  0x81   : > { %4495 = vmatprep.mubr.msk.bf16.mxu1 %vm1033_vm0, %v6569_v46 }
  0x87   : > { %4468 = vmatmul.mubr.msk.bf16.gmra.mrb[20].mxu0 %vm1033_vm0, %v5745_v22 }
  0x88   : > { %4496 = vmatmul.mubr.msk.bf16.gmra.mrb[44].mxu1 %vm1033_vm0, %v6571_v3  ;;  %4471 = vmatprep.mubr.msk.bf16.mxu0 %vm1033_vm0, %v5798_v59 }
  0x89   : > { %4499 = vmatprep.mubr.msk.bf16.mxu1 %vm1033_vm0, %v6572_v21 }
  0x8f   : > { %4472 = vmatmul.mubr.msk.bf16.gmra.mrb[24].mxu0 %vm1033_vm0, %v5763_v29 }
  0x90   : > { %4500 = vmatmul.mubr.msk.bf16.gmra.mrb[48].mxu1 %vm1033_vm0, %v6573_v43  ;;  %4475 = vmatprep.mubr.msk.bf16.mxu0 %vm1033_vm0, %v5814_v49 }
  0x91   : > { %4503 = vmatprep.mubr.msk.bf16.mxu1 %vm1033_vm0, %v6574_v55 }
  0x97   : > { %4476 = vmatmul.mubr.msk.bf16.gmra.mrb[28].mxu0 %vm1033_vm0, %v5779_v16 }
  0x98   : > { %4504 = vmatmul.mubr.msk.bf16.gmra.mrb[52].mxu1 %vm1033_vm0, %v5549_v10  ;;  %4591 = vmatprep.mubr.msk.bf16.mxu0 %vm1033_vm0, %v5227_v31  ;;  %v4988_v31 = vld [vmem:[%s6421_s1 + $0x80] sm:$0xff]  }
  0x99   : > { %4507 = vmatprep.mubr.msk.bf16.mxu1 %vm1033_vm0, %v5577_v6 }
  0x9f   : > { %4592 = vmatmul.mubr.msk.bf16.vlgmr.msra.gmra.mrb[32].mxu0 %vm1033_vm0, %v6555_v26  ;;  %v6575_v26 = vld [vmem:[#allocation3_spill] sm:$0xff] }
  0xa0   : > { %4508 = vmatmul.mubr.msk.bf16.gmra.mrb[56].mxu1 %vm1033_vm0, %v5609_v37  ;;  %4624 = vmatpush3.bf16.msra.mxu0 %v5630_v17  ;;  %v4990_v17 = vld [vmem:[%s6421_s1 + $0x58] sm:$0xff]  }
  0xa1   : > { %4511 = vmatprep.mubr.msk.bf16.mxu1 %vm1033_vm0, %v5632_v39  ;;  %4595 = vmatprep.mubr.msk.bf16.mxu0 %vm1033_vm0, %v6556_v14  ;;  %v6576_v14 = vld [vmem:[#allocation4_spill] sm:$0xff] }
  0xa2   : > { %4625 = vmatprep.subr.bf16.mxu0 %v4987_v48 }
  0xa4   : > { %4626 = vmatpush3.bf16.msra.mxu0 %v4987_v48 }
  0xa5   : > { %4659 = vmatprep.subr.bf16.mxu0 %v4988_v31 }
  0xa7   : > { %4596 = vmatmul.mubr.msk.bf16.gmra.mrb[36].mxu0 %vm1033_vm0, %v6563_v54  ;;  %v6585_v54 = vld [vmem:[#allocation26_spill] sm:$0xff] }
  0xa8   : > { %4512 = vmatmul.mubr.msk.bf16.gmra.mrb[60].mxu1 %vm1033_vm0, %v5660_v7  ;;  %4599 = vmatprep.mubr.msk.bf16.mxu0 %vm1033_vm0, %v6564_v38 }
  0xa9   : > { %4519 = vmatprep.mubr.msk.bf16.mxu1 %vm1033_vm0, %v6575_v26 }
  0xaf   : > { %4600 = vmatmul.mubr.msk.bf16.gmra.mrb[40].mxu0 %vm1033_vm0, %v6568_v35 }
  0xb0   : > { %4520 = vmatmul.mubr.msk.bf16.vlgmr.msra.gmra.mrb[32].mxu1 %vm1033_vm0, %v6576_v14  ;;  %4603 = vmatprep.mubr.msk.bf16.mxu0 %vm1033_vm0, %v6569_v46 }
  0xb1   : > { %4523 = vmatprep.mubr.msk.bf16.mxu1 %vm1033_vm0, %v6577_v42  ;;  %4552 = vmatpush3.bf16.msra.mxu1 %v5743_v0  ;;  %v6581_v0 = vld [vmem:[#allocation10_spill] sm:$0xff] }
  0xb2   : > { %4553 = vmatprep.subr.bf16.mxu1 %v4990_v17 }
  0xb5   : > { %4554 = vmatpush3.bf16.msra.mxu1 %v4990_v17 }
  0xb7   : > { %4604 = vmatmul.mubr.msk.bf16.gmra.mrb[44].mxu0 %vm1033_vm0, %v6571_v3 }
  0xb8   : > { %4524 = vmatmul.mubr.msk.bf16.gmra.mrb[36].mxu1 %vm1033_vm0, %v6578_v41  ;;  %4607 = vmatprep.mubr.msk.bf16.mxu0 %vm1033_vm0, %v6572_v21 }
  0xb9   : > { %4527 = vmatprep.mubr.msk.bf16.mxu1 %vm1033_vm0, %v6579_v32 }
  0xbf   : > { %4608 = vmatmul.mubr.msk.bf16.gmra.mrb[48].mxu0 %vm1033_vm0, %v6573_v43 }
  0xc0   : > { %4528 = vmatmul.mubr.msk.bf16.gmra.mrb[40].mxu1 %vm1033_vm0, %v6580_v60  ;;  %4611 = vmatprep.mubr.msk.bf16.mxu0 %vm1033_vm0, %v6574_v55 }
  0xc1   : > { %4531 = vmatprep.mubr.msk.bf16.mxu1 %vm1033_vm0, %v6581_v0 }
  0xc7   : > { %4612 = vmatmul.mubr.msk.bf16.gmra.mrb[52].mxu0 %vm1033_vm0, %v5549_v10  ;;  %v6587_v10 = vld [vmem:[#allocation35_spill] sm:$0xff] }
  0xc8   : > { %4532 = vmatmul.mubr.msk.bf16.gmra.mrb[44].mxu1 %vm1033_vm0, %v6582_v23  ;;  %4615 = vmatprep.mubr.msk.bf16.mxu0 %vm1033_vm0, %v5577_v6  ;;  %v4991_v6 = vld [vmem:[%s6421_s1 + $0x88] sm:$0xff]  }
  0xc9   : > { %4535 = vmatprep.mubr.msk.bf16.mxu1 %vm1033_vm0, %v6583_v1 }
  0xcf   : > { %4616 = vmatmul.mubr.msk.bf16.gmra.mrb[56].mxu0 %vm1033_vm0, %v5609_v37  ;;  %v6588_v37 = vld [vmem:[#allocation39_spill] sm:$0xff] }
  0xd0   : > { %4536 = vmatmul.mubr.msk.bf16.gmra.mrb[48].mxu1 %vm1033_vm0, %v6584_v15  ;;  %4619 = vmatprep.mubr.msk.bf16.mxu0 %vm1033_vm0, %v5632_v39  ;;  %v6589_v39 = vld [vmem:[#allocation42_spill] sm:$0xff] }
  0xd1   : > { %4539 = vmatprep.mubr.msk.bf16.mxu1 %vm1033_vm0, %v6585_v54 }
  0xd7   : > { %4620 = vmatmul.mubr.msk.bf16.gmra.mrb[60].mxu0 %vm1033_vm0, %v5660_v7  ;;  %v6590_v7 = vld [vmem:[#allocation44_spill] sm:$0xff] }
  0xd8   : > { %4540 = vmatmul.mubr.msk.bf16.gmra.mrb[52].mxu1 %vm1033_vm0, %v6586_v34  ;;  %4627 = vmatprep.mubr.msk.bf16.mxu0 %vm1033_vm0, %v6575_v26 }
  0xd9   : > { %4543 = vmatprep.mubr.msk.bf16.mxu1 %vm1033_vm0, %v6587_v10 }
  0xdf   : > { %4628 = vmatmul.mubr.msk.bf16.vlgmr.msra.gmra.mrb[32].mxu0 %vm1033_vm0, %v6576_v14 }
  0xe0   : > { %4544 = vmatmul.mubr.msk.bf16.gmra.mrb[56].mxu1 %vm1033_vm0, %v6588_v37  ;;  %4660 = vmatpush3.bf16.msra.mxu0 %v4988_v31 }
  0xe1   : > { %4547 = vmatprep.mubr.msk.bf16.mxu1 %vm1033_vm0, %v6589_v39  ;;  %4631 = vmatprep.mubr.msk.bf16.mxu0 %vm1033_vm0, %v6577_v42 }
  0xe2   : > { %4661 = vmatprep.subr.bf16.mxu0 %v4991_v6 }
  0xe4   : > { %4662 = vmatpush3.bf16.msra.mxu0 %v4991_v6 }
  0xe7   : > { %4632 = vmatmul.mubr.msk.bf16.gmra.mrb[36].mxu0 %vm1033_vm0, %v6578_v41 }
  0xe8   : > { %4548 = vmatmul.mubr.msk.bf16.gmra.mrb[60].mxu1 %vm1033_vm0, %v6590_v7  ;;  %4635 = vmatprep.mubr.msk.bf16.mxu0 %vm1033_vm0, %v6579_v32 }
  0xe9   : > { %4555 = vmatprep.mubr.msk.bf16.mxu1 %vm1033_vm0, %v5579_v28 }
  0xef   : > { %4636 = vmatmul.mubr.msk.bf16.gmra.mrb[40].mxu0 %vm1033_vm0, %v6580_v60 }
  0xf0   : > { %4556 = vmatmul.mubr.msk.bf16.vlgmr.msra.gmra.mrb[32].mxu1 %vm1033_vm0, %v5604_v12  ;;  %4639 = vmatprep.mubr.msk.bf16.mxu0 %vm1033_vm0, %v6581_v0 }
  0xf1   : > { %4559 = vmatprep.mubr.msk.bf16.mxu1 %vm1033_vm0, %v5654_v24 }
  0xf7   : > { %4640 = vmatmul.mubr.msk.bf16.gmra.mrb[44].mxu0 %vm1033_vm0, %v6582_v23 }
  0xf8   : > { %4560 = vmatmul.mubr.msk.bf16.gmra.mrb[36].mxu1 %vm1033_vm0, %v5656_v51  ;;  %4643 = vmatprep.mubr.msk.bf16.mxu0 %vm1033_vm0, %v6583_v1 }
  0xf9   : > { %4563 = vmatprep.mubr.msk.bf16.mxu1 %vm1033_vm0, %v5681_v2 }
  0xfa   : > { %v4377_v25 = vpop.f32.mrb[0].mxu1 }
  0xfb   : > { %v1116_v4 = vpop.f32.mrb[1].mxu1 }
  0xfc   : > { %v4378_v38 = vpop.f32.mrb[2].mxu1 }
  0xfd   : > { %v1119_v53 = vpop.f32.mrb[3].mxu1 }
  0xff   : > { %4644 = vmatmul.mubr.msk.bf16.gmra.mrb[48].mxu0 %vm1033_vm0, %v6584_v15 }
 0x100   : > { %4564 = vmatmul.mubr.msk.bf16.gmra.mrb[40].mxu1 %vm1033_vm0, %v5692_v62  ;;  %4647 = vmatprep.mubr.msk.bf16.mxu0 %vm1033_vm0, %v6585_v54 }
 0x101   : > { %4567 = vmatprep.mubr.msk.bf16.mxu1 %vm1033_vm0, %v5697_v27 }
 0x103   : > { %v4381_v11 = vpop.f32.mrb[4].mxu1 }
 0x104   : > { %v1132_v36 = vpop.f32.mrb[5].mxu1 }
 0x105   : > { %v4382_v58 = vpop.f32.mrb[6].mxu1 }
 0x106   : > { %v1135_v57 = vpop.f32.mrb[7].mxu1 }
 0x107   : > { %4648 = vmatmul.mubr.msk.bf16.gmra.mrb[52].mxu0 %vm1033_vm0, %v6586_v34 }
 0x108   : > { %4568 = vmatmul.mubr.msk.bf16.gmra.mrb[44].mxu1 %vm1033_vm0, %v5703_v45  ;;  %4651 = vmatprep.mubr.msk.bf16.mxu0 %vm1033_vm0, %v6587_v10 }
 0x109   : > { %4571 = vmatprep.mubr.msk.bf16.mxu1 %vm1033_vm0, %v5748_v20 }
 0x10c   : > { %v4385_v33 = vpop.f32.mrb[8].mxu1 }
 0x10d   : > { %v5958_v40 = vpop.f32.mrb[9].mxu1 }
 0x10e   : > { %v4386_v63 = vpop.f32.mrb[10].mxu1 }
 0x10f   : > { %4652 = vmatmul.mubr.msk.bf16.gmra.mrb[56].mxu0 %vm1033_vm0, %v6588_v37  ;;  %v1151_v44 = vpop.f32.mrb[11].mxu1 }
 0x110   : > { %4572 = vmatmul.mubr.msk.bf16.gmra.mrb[48].mxu1 %vm1033_vm0, %v5725_v56  ;;  %4655 = vmatprep.mubr.msk.bf16.mxu0 %vm1033_vm0, %v6589_v39 }
 0x111   : > { %4575 = vmatprep.mubr.msk.bf16.mxu1 %vm1033_vm0, %v5781_v18 }
 0x115   : > { %v5968_v30 = vpop.f32.mrb[12].mxu1 }
 0x116   : > { %v5974_v35 = vpop.f32.mrb[13].mxu1 }
 0x117   : > { %4656 = vmatmul.mubr.msk.bf16.gmra.mrb[60].mxu0 %vm1033_vm0, %v6590_v7  ;;  %v4390_v46 = vpop.f32.mrb[14].mxu1 }
 0x118   : > { %4576 = vmatmul.mubr.msk.bf16.gmra.mrb[52].mxu1 %vm1033_vm0, %v5745_v22  ;;  %4663 = vmatprep.mubr.msk.bf16.mxu0 %vm1033_vm0, %v5579_v28  ;;  %v5980_v9 = vpop.f32.mrb[15].mxu1 }
 0x119   : > { %4579 = vmatprep.mubr.msk.bf16.mxu1 %vm1033_vm0, %v5798_v59 }
 0x11e   : > { %v5986_v5 = vpop.f32.mrb[16].mxu1 }
 0x11f   : > { %4664 = vmatmul.mubr.msk.bf16.vlgmr.msra.gmra.mrb[32].mxu0 %vm1033_vm0, %v5604_v12  ;;  %v5992_v8 = vpop.f32.mrb[17].mxu1 }
 0x120   : > { %4580 = vmatmul.mubr.msk.bf16.gmra.mrb[56].mxu1 %vm1033_vm0, %v5763_v29  ;;  %4667 = vmatprep.mubr.msk.bf16.mxu0 %vm1033_vm0, %v5654_v24  ;;  %v5994_v28 = vpop.f32.mrb[18].mxu1 }
 0x121   : > { %4583 = vmatprep.mubr.msk.bf16.mxu1 %vm1033_vm0, %v5814_v49  ;;  %v5996_v19 = vpop.f32.mrb[19].mxu1 }
 0x127   : > { %4668 = vmatmul.mubr.msk.bf16.gmra.mrb[36].mxu0 %vm1033_vm0, %v5656_v51  ;;  %v6004_v12 = vpop.f32.mrb[20].mxu1 }
 0x128   : > { %4584 = vmatmul.mubr.msk.bf16.gmra.mrb[60].mxu1 %vm1033_vm0, %v5779_v16  ;;  %4671 = vmatprep.mubr.msk.bf16.mxu0 %vm1033_vm0, %v5681_v2  ;;  %v6006_v50 = vpop.f32.mrb[21].mxu1 }
 0x129   : > { %v6008_v24 = vpop.f32.mrb[22].mxu1 }
 0x12a   : > { %v6010_v52 = vpop.f32.mrb[23].mxu1 }
 0x12f   : > { %4672 = vmatmul.mubr.msk.bf16.gmra.mrb[40].mxu0 %vm1033_vm0, %v5692_v62 }
 0x130   : > { %4675 = vmatprep.mubr.msk.bf16.mxu0 %vm1033_vm0, %v5697_v27 }
 0x131   : > { %v6018_v21 = vpop.f32.mrb[24].mxu1 }
 0x132   : > { %v4449_v47 = vpop.f32.mrb[0].mxu0  ;;  %v6022_v13 = vpop.f32.mrb[25].mxu1 }
 0x133   : > { %v6016_v3 = vadd.f32 %v4449_v47, %v4377_v25  ;;  %v1659_v51 = vpop.f32.mrb[1].mxu0  ;;  %v6026_v48 = vpop.f32.mrb[26].mxu1 }
 0x134   : > { %v6020_v2 = vadd.f32 %v1659_v51, %v1116_v4  ;;  %v4450_v61 = vpop.f32.mrb[2].mxu0  ;;  %v6030_v31 = vpop.f32.mrb[27].mxu1 }
 0x135   : > { %v6024_v43 = vadd.f32 %v4450_v61, %v4378_v38  ;;  %v1662_v55 = vpop.f32.mrb[3].mxu0 }
 0x136   : > { %v6028_v62 = vadd.f32 %v1662_v55, %v1119_v53  ;;  %v4995_v55 = vld [vmem:[%s6424_s4 + $0x18] sm:$0xff]  }
 0x137   : > { %4676 = vmatmul.mubr.msk.bf16.gmra.mrb[44].mxu0 %vm1033_vm0, %v5703_v45 }
 0x138   : > { %4679 = vmatprep.mubr.msk.bf16.mxu0 %vm1033_vm0, %v5748_v20 }
 0x13a   : > { %v4453_v27 = vpop.f32.mrb[4].mxu0 }
 0x13b   : > { %v4405_v26 = vpop.f32.mrb[28].mxu1  ;;  %v6036_v17 = vadd.f32 %v4453_v27, %v4381_v11  ;;  %v1675_v14 = vpop.f32.mrb[5].mxu0 }
 0x13c   : > { %v6038_v42 = vpop.f32.mrb[29].mxu1  ;;  %v6040_v41 = vadd.f32 %v1675_v14, %v1132_v36  ;;  %v4454_v32 = vpop.f32.mrb[6].mxu0 }
 0x13d   : > { %v4406_v60 = vpop.f32.mrb[30].mxu1  ;;  %v6042_v0 = vadd.f32 %v4454_v32, %v4382_v58  ;;  %v1678_v23 = vpop.f32.mrb[7].mxu0  ;;  %v4997_v32 = vld [vmem:[%s6424_s4 + $0x28] sm:$0xff]  }
 0x13e   : > { %v6044_v1 = vpop.f32.mrb[31].mxu1  ;;  %v6046_v45 = vadd.f32 %v1678_v23, %v1135_v57  ;;  %v4999_v60 = vld [vmem:[%s6424_s4 + $0x38] sm:$0xff]  }
 0x13f   : > { %4680 = vmatmul.mubr.msk.bf16.gmra.mrb[48].mxu0 %vm1033_vm0, %v5725_v56 }
 0x140   : > { %4683 = vmatprep.mubr.msk.bf16.mxu0 %vm1033_vm0, %v5781_v18 }
 0x142   : > { %v4457_v20 = vpop.f32.mrb[8].mxu0 }
 0x143   : > { %v6052_v15 = vadd.f32 %v4457_v20, %v4385_v33  ;;  %v1691_v54 = vpop.f32.mrb[9].mxu0 }
 0x144   : > { %v6055_v34 = vadd.f32 %v1691_v54, %v5958_v40  ;;  %v4458_v10 = vpop.f32.mrb[10].mxu0 }
 0x145   : > { %v6057_v6 = vadd.f32 %v4458_v10, %v4386_v63  ;;  %v1694_v37 = vpop.f32.mrb[11].mxu0 }
 0x146   : > { %v6059_v39 = vadd.f32 %v1694_v37, %v1151_v44 }
 0x147   : > { %4684 = vmatmul.mubr.msk.bf16.gmra.mrb[52].mxu0 %vm1033_vm0, %v5745_v22  ;;  %v4992_v22 = vld [vmem:[%s6424_s4] sm:$0xff]  }
 0x148   : > { %4687 = vmatprep.mubr.msk.bf16.mxu0 %vm1033_vm0, %v5798_v59  ;;  %4695 = vmatprep.subr.bf16.mxu1 %v4992_v22 }
 0x149   : > { %4696 = vmatpush3.bf16.msra.mxu1 %v4992_v22 }
 0x14a   : > { %v4461_v56 = vpop.f32.mrb[12].mxu0 }
 0x14b   : > { %v6066_v18 = vadd.f32 %v4461_v56, %v5968_v30  ;;  %v1707_v7 = vpop.f32.mrb[13].mxu0 }
 0x14c   : > { %v6069_v25 = vadd.f32 %v1707_v7, %v5974_v35  ;;  %v4462_v4 = vpop.f32.mrb[14].mxu0 }
 0x14d   : > { %v6071_v38 = vadd.f32 %v4462_v4, %v4390_v46  ;;  %v1710_v53 = vpop.f32.mrb[15].mxu0 }
 0x14e   : > { %v6074_v11 = vadd.f32 %v1710_v53, %v5980_v9 }
 0x14f   : > { %4688 = vmatmul.mubr.msk.bf16.gmra.mrb[56].mxu0 %vm1033_vm0, %v5763_v29 }
 0x150   : > { %4691 = vmatprep.mubr.msk.bf16.mxu0 %vm1033_vm0, %v5814_v49  ;;  %v4993_v49 = vld [vmem:[%s6424_s4 + $0x8] sm:$0xff]  }
 0x151   : > { %4697 = vmatprep.subr.bf16.mxu1 %v4993_v49 }
 0x152   : > { %v4465_v59 = vpop.f32.mrb[16].mxu0  ;;  %4698 = vmatpush3.bf16.msra.mxu1 %v4993_v49 }
 0x153   : > { %v6084_v36 = vadd.f32 %v4465_v59, %v5986_v5  ;;  %v1723_v58 = vpop.f32.mrb[17].mxu0 }
 0x154   : > { %v6087_v57 = vadd.f32 %v1723_v58, %v5992_v8  ;;  %v4466_v33 = vpop.f32.mrb[18].mxu0 }
 0x155   : > { %v6090_v40 = vadd.f32 %v4466_v33, %v5994_v28  ;;  %v1726_v63 = vpop.f32.mrb[19].mxu0 }
 0x156   : > { %v6093_v29 = vadd.f32 %v1726_v63, %v5996_v19 }
 0x157   : > { %4692 = vmatmul.mubr.msk.bf16.gmra.mrb[60].mxu0 %vm1033_vm0, %v5779_v16  ;;  %v4994_v16 = vld [vmem:[%s6424_s4 + $0x10] sm:$0xff]  }
 0x158   : > { %4699 = vmatprep.subr.bf16.mxu1 %v4994_v16 }
 0x159   : > { %4700 = vmatpush3.bf16.msra.mxu1 %v4994_v16 }
 0x15a   : > { %v4469_v44 = vpop.f32.mrb[20].mxu0  ;;  %4701 = vmatprep.subr.bf16.mxu1 %v4995_v55 }
 0x15b   : > { %v6101_v30 = vadd.f32 %v4469_v44, %v6004_v12  ;;  %v1739_v35 = vpop.f32.mrb[21].mxu0 }
 0x15c   : > { %v6104_v46 = vadd.f32 %v1739_v35, %v6006_v50  ;;  %v4470_v9 = vpop.f32.mrb[22].mxu0 }
 0x15d   : > { %v6107_v5 = vadd.f32 %v4470_v9, %v6008_v24  ;;  %v1742_v8 = vpop.f32.mrb[23].mxu0  ;;  %4702 = vmatpush3.bf16.msra.mxu1 %v4995_v55 }
 0x15e   : > { %v6110_v28 = vadd.f32 %v1742_v8, %v6010_v52 }
 0x162   : > { %v4473_v19 = vpop.f32.mrb[24].mxu0 }
 0x163   : > { %v6116_v12 = vadd.f32 %v4473_v19, %v6018_v21  ;;  %v1755_v50 = vpop.f32.mrb[25].mxu0 }
 0x164   : > { %v6119_v47 = vadd.f32 %v1755_v50, %v6022_v13  ;;  %v4474_v24 = vpop.f32.mrb[26].mxu0 }
 0x165   : > { %v6122_v51 = vadd.f32 %v4474_v24, %v6026_v48  ;;  %v1758_v52 = vpop.f32.mrb[27].mxu0 }
 0x166   : > { %v6125_v61 = vadd.f32 %v1758_v52, %v6030_v31  ;;  %v4996_v31 = vld [vmem:[%s6424_s4 + $0x20] sm:$0xff]  }
 0x167   : > { %4703 = vmatprep.subr.bf16.mxu1 %v4996_v31 }
 0x168   : > { %4704 = vmatpush3.bf16.msra.mxu1 %v4996_v31 }
 0x169   : > { %4705 = vmatprep.subr.bf16.mxu1 %v4997_v32 }
 0x16a   : > { %v4477_v21 = vpop.f32.mrb[28].mxu0 }
 0x16b   : > { %v1771_v27 = vpop.f32.mrb[29].mxu0 }
 0x16c   : > { %v6131_v26 = vadd.f32 %v1771_v27, %v6038_v42  ;;  %v4478_v13 = vpop.f32.mrb[30].mxu0  ;;  %4706 = vmatpush3.bf16.msra.mxu1 %v4997_v32  ;;  %v4998_v42 = vld [vmem:[%s6424_s4 + $0x30] sm:$0xff]  }
 0x16d   : > { %v1774_v14 = vpop.f32.mrb[31].mxu0  ;;  %4707 = vmatprep.subr.bf16.mxu1 %v4998_v42 }
 0x16e   : > { %v6134_v48 = vadd.f32 %v1774_v14, %v6044_v1 }
 0x170   : > { %4708 = vmatpush3.bf16.msra.mxu1 %v4998_v42 }
 0x171   : > { %4709 = vmatprep.subr.bf16.mxu1 %v4999_v60 }
 0x174   : > { %4710 = vmatpush3.bf16.msra.mxu1 %v4999_v60 }
 0x1c3   : > { %v4557_v23 = vpop.f32.mrb[32].mxu1 }
 0x1c4   : > { %v6149_v1 = vadd.f32 %v6020_v2, %v4557_v23  ;;  %v2325_v20 = vpop.f32.mrb[33].mxu1 }
 0x1c5   : > { %v4558_v54 = vpop.f32.mrb[34].mxu1 }
 0x1c6   : > { %v6152_v10 = vadd.f32 %v6028_v62, %v4558_v54  ;;  %v2328_v37 = vpop.f32.mrb[35].mxu1 }
 0x1cb   : > { %v4561_v56 = vpop.f32.mrb[36].mxu1 }
 0x1cc   : > { %v6155_v7 = vadd.f32 %v6040_v41, %v4561_v56  ;;  %v2341_v4 = vpop.f32.mrb[37].mxu1  ;;  %v6229_v56 = vld [vmem:[%s6423_s3] ss:$0 sm:$0xff] }
 0x1cd   : > { %v2523_v53 = vadd.f32 %v6016_v3, %v2341_v4  ;;  %v4562_v22 = vpop.f32.mrb[38].mxu1 }
 0x1ce   : > { %v6159_v59 = vadd.f32 %v6046_v45, %v4562_v22  ;;  %v2344_v58 = vpop.f32.mrb[39].mxu1 }
 0x1cf   : > { %v6162_v2 = vadd.f32 %v6024_v43, %v2344_v58 }
 0x1d3   : > { %v4565_v33 = vpop.f32.mrb[40].mxu1 }
 0x1d4   : > { %v6165_v62 = vadd.f32 %v6055_v34, %v4565_v33  ;;  %v2357_v63 = vpop.f32.mrb[41].mxu1 }
 0x1d5   : > { %v6168_v49 = vadd.f32 %v6036_v17, %v2357_v63  ;;  %v4566_v41 = vpop.f32.mrb[42].mxu1 }
 0x1d6   : > { %v6171_v44 = vadd.f32 %v6059_v39, %v4566_v41  ;;  %v2360_v3 = vpop.f32.mrb[43].mxu1 }
 0x1d7   : > { %v6174_v45 = vadd.f32 %v6042_v0, %v2360_v3 }
 0x1db   : > { %v4569_v35 = vpop.f32.mrb[44].mxu1 }
 0x1dc   : > { %v6177_v43 = vadd.f32 %v6069_v25, %v4569_v35  ;;  %v2373_v9 = vpop.f32.mrb[45].mxu1 }
 0x1dd   : > { %v6180_v34 = vadd.f32 %v6052_v15, %v2373_v9  ;;  %v4570_v8 = vpop.f32.mrb[46].mxu1 }
 0x1de   : > { %v6183_v17 = vadd.f32 %v6074_v11, %v4570_v8  ;;  %v2376_v16 = vpop.f32.mrb[47].mxu1 }
 0x1df   : > { %v6186_v39 = vadd.f32 %v6057_v6, %v2376_v16 }
 0x1e3   : > { %v4573_v19 = vpop.f32.mrb[48].mxu1 }
 0x1e4   : > { %v6189_v0 = vadd.f32 %v6087_v57, %v4573_v19  ;;  %v2389_v50 = vpop.f32.mrb[49].mxu1 }
 0x1e5   : > { %v6192_v25 = vadd.f32 %v6066_v18, %v2389_v50  ;;  %v4574_v24 = vpop.f32.mrb[50].mxu1 }
 0x1e6   : > { %v6195_v15 = vadd.f32 %v6093_v29, %v4574_v24  ;;  %v2392_v52 = vpop.f32.mrb[51].mxu1 }
 0x1e7   : > { %v6198_v11 = vadd.f32 %v6071_v38, %v2392_v52  ;;  %v6215_v38 = vld [vmem:[%s6422_s2] ss:$0 sm:$0xff] }
 0x1eb   : > { %v4577_v55 = vpop.f32.mrb[52].mxu1 }
 0x1ec   : > { %v6201_v6 = vadd.f32 %v6104_v46, %v4577_v55  ;;  %v2405_v21 = vpop.f32.mrb[53].mxu1 }
 0x1ed   : > { %v6204_v57 = vadd.f32 %v6084_v36, %v2405_v21  ;;  %v4578_v27 = vpop.f32.mrb[54].mxu1 }
 0x1ee   : > { %v6207_v18 = vadd.f32 %v6110_v28, %v4578_v27  ;;  %v2408_v13 = vpop.f32.mrb[55].mxu1 }
 0x1ef   : > { %v6210_v29 = vadd.f32 %v6090_v40, %v2408_v13 }
 0x1f2   : > { %v4665_v31 = vpop.f32.mrb[32].mxu0 }
 0x1f3   : > { %v4581_v14 = vpop.f32.mrb[56].mxu1  ;;  %v3185_v32 = vadd.f32 %v4665_v31, %v2325_v20  ;;  %v2990_v42 = vpop.f32.mrb[33].mxu0 }
 0x1f4   : > { %v6218_v46 = vadd.f32 %v6119_v47, %v4581_v14  ;;  %v2421_v36 = vpop.f32.mrb[57].mxu1  ;;  %v4666_v23 = vpop.f32.mrb[34].mxu0 }
 0x1f5   : > { %v6221_v28 = vadd.f32 %v6101_v30, %v2421_v36  ;;  %v4582_v60 = vpop.f32.mrb[58].mxu1  ;;  %v3290_v47 = vmul.f32 %v6215_v38, %v3185_v32  ;;  %v3186_v4 = vadd.f32 %v4666_v23, %v2328_v37  ;;  %v2993_v22 = vpop.f32.mrb[35].mxu0 }
 0x1f6   : > { %v6224_v40 = vadd.f32 %v6125_v61, %v4582_v60  ;;  %v2424_v54 = vpop.f32.mrb[59].mxu1 }
 0x1f7   : > { %v6233_v20 = vadd.f32 %v6107_v5, %v2424_v54  ;;  %v3291_v30 = vmul.f32 %v6215_v38, %v3186_v4  ;;  %v3328_v58 = vadd.f32 %v6229_v56, %v3290_v47 }
 0x1f9   : > { %v3329_v61 = vadd.f32 %v6229_v56, %v3291_v30  ;;  %v3360_v16 = vmax.f32 %v3328_v58, 0.0 }
 0x1fa   : > { %v4669_v63 = vpop.f32.mrb[36].mxu0 }
 0x1fb   : > { %v4585_v33 = vpop.f32.mrb[60].mxu1  ;;  %v3361_v35 = vmax.f32 %v3329_v61, 0.0  ;;  %v3189_v9 = vadd.f32 %v4669_v63, %v2523_v53  ;;  %v3006_v8 = vpop.f32.mrb[37].mxu0 }
 0x1fc   : > { %v2549_v41 = vadd.f32 %v6131_v26, %v4585_v33  ;;  %v2437_v3 = vpop.f32.mrb[61].mxu1  ;;  %v3187_v19 = vadd.f32 %v3006_v8, %v6149_v1  ;;  %v4670_v50 = vpop.f32.mrb[38].mxu0 }
 0x1fd   : > { %v6240_v37 = vadd.f32 %v6116_v12, %v2437_v3  ;;  %v4586_v5 = vpop.f32.mrb[62].mxu1  ;;  %v3294_v21 = vmul.f32 %v6215_v38, %v3189_v9  ;;  %v3190_v26 = vadd.f32 %v4670_v50, %v6162_v2  ;;  %v3009_v27 = vpop.f32.mrb[39].mxu0  ;;  %v3392_v14 = vpack.c.bf16 %v3361_v35, %v3360_v16 }
 0x1fe   : > { %v3320_v24 = vmul.f32 %v6215_v38, %v2549_v41  ;;  %v2550_v52 = vadd.f32 %v6134_v48, %v4586_v5  ;;  %v2440_v55 = vpop.f32.mrb[63].mxu1  ;;  %v3292_v12 = vmul.f32 %v6215_v38, %v3187_v19  ;;  %v3188_v13 = vadd.f32 %v3009_v27, %v6152_v10 }
 0x1ff   : > { %v6248_v53 = vadd.f32 %v6122_v51, %v2440_v55  ;;  %v3332_v48 = vadd.f32 %v6229_v56, %v3294_v21  ;;  %v3295_v36 = vmul.f32 %v6215_v38, %v3190_v26  ;;  %4711 = vmatprep.mubr.bf16.mxu1 %v3392_v14 }
 0x200   : > { %v3358_v1 = vadd.f32 %v6229_v56, %v3320_v24  ;;  %v3321_v31 = vmul.f32 %v6215_v38, %v2550_v52  ;;  %v3330_v32 = vadd.f32 %v6229_v56, %v3292_v12  ;;  %v3293_v2 = vmul.f32 %v6215_v38, %v3188_v13 }
 0x201   : > { %v3333_v42 = vadd.f32 %v6229_v56, %v3295_v36  ;;  %v3364_v47 = vmax.f32 %v3332_v48, 0.0 }
 0x202   : > { %v3359_v51 = vadd.f32 %v6229_v56, %v3321_v31  ;;  %v3390_v60 = vmax.f32 %v3358_v1, 0.0  ;;  %v3331_v10 = vadd.f32 %v6229_v56, %v3293_v2  ;;  %v4673_v23 = vpop.f32.mrb[40].mxu0  ;;  %v3362_v58 = vmax.f32 %v3330_v32, 0.0 }
 0x203   : > { %v3365_v4 = vmax.f32 %v3333_v42, 0.0  ;;  %v3193_v22 = vadd.f32 %v4673_v23, %v6168_v49  ;;  %v3022_v30 = vpop.f32.mrb[41].mxu0 }
 0x204   : > { %v3391_v54 = vmax.f32 %v3359_v51, 0.0  ;;  %v3363_v61 = vmax.f32 %v3331_v10, 0.0  ;;  %v3191_v33 = vadd.f32 %v3022_v30, %v6155_v7  ;;  %v4674_v63 = vpop.f32.mrb[42].mxu0 }
 0x205   : > { %v3298_v41 = vmul.f32 %v6215_v38, %v3193_v22  ;;  %v3194_v3 = vadd.f32 %v4674_v63, %v6174_v45  ;;  %v3025_v35 = vpop.f32.mrb[43].mxu0  ;;  %v3394_v9 = vpack.c.bf16 %v3365_v4, %v3364_v47 }
 0x206   : > { %v6265_v8 = vpack.c.bf16 %v3391_v54, %v3390_v60  ;;  %v3393_v16 = vpack.c.bf16 %v3363_v61, %v3362_v58  ;;  %v3296_v5 = vmul.f32 %v6215_v38, %v3191_v33  ;;  %v3192_v19 = vadd.f32 %v3025_v35, %v6159_v59 }
 0x207   : > { %v3336_v49 = vadd.f32 %v6229_v56, %v3298_v41  ;;  %v3299_v50 = vmul.f32 %v6215_v38, %v3194_v3 }
 0x208   : > { %v3334_v7 = vadd.f32 %v6229_v56, %v3296_v5  ;;  %v3297_v24 = vmul.f32 %v6215_v38, %v3192_v19  ;;  %4712 = vmatmul.mubr.bf16.vlgmr.msra.gmra.mrb[64].mxu1 %v3393_v16 }
 0x209   : > { %v3337_v45 = vadd.f32 %v6229_v56, %v3299_v50  ;;  %4715 = vmatprep.mubr.bf16.mxu1 %v3394_v9  ;;  %v3368_v21 = vmax.f32 %v3336_v49, 0.0 }
 0x20a   : > { %v3335_v52 = vadd.f32 %v6229_v56, %v3297_v24  ;;  %v4677_v55 = vpop.f32.mrb[44].mxu0  ;;  %v3366_v12 = vmax.f32 %v3334_v7, 0.0 }
 0x20b   : > { %v3369_v26 = vmax.f32 %v3337_v45, 0.0  ;;  %v3197_v27 = vadd.f32 %v4677_v55, %v6180_v34  ;;  %v3038_v59 = vpop.f32.mrb[45].mxu0 }
 0x20c   : > { %v3367_v13 = vmax.f32 %v3335_v52, 0.0  ;;  %v3195_v14 = vadd.f32 %v3038_v59, %v6165_v62  ;;  %v4678_v1 = vpop.f32.mrb[46].mxu0 }
 0x20d   : > { %v3302_v31 = vmul.f32 %v6215_v38, %v3197_v27  ;;  %v3198_v48 = vadd.f32 %v4678_v1, %v6186_v39  ;;  %v3041_v36 = vpop.f32.mrb[47].mxu0  ;;  %v3396_v32 = vpack.c.bf16 %v3369_v26, %v3368_v21 }
 0x20e   : > { %v3300_v2 = vmul.f32 %v6215_v38, %v3195_v14  ;;  %v3196_v51 = vadd.f32 %v3041_v36, %v6171_v44  ;;  %v3395_v42 = vpack.c.bf16 %v3367_v13, %v3366_v12 }
 0x20f   : > { %v3340_v60 = vadd.f32 %v6229_v56, %v3302_v31  ;;  %v3303_v34 = vmul.f32 %v6215_v38, %v3198_v48 }
 0x210   : > { %v3338_v10 = vadd.f32 %v6229_v56, %v3300_v2  ;;  %v3301_v62 = vmul.f32 %v6215_v38, %v3196_v51  ;;  %4716 = vmatmul.mubr.bf16.gmra.mrb[68].mxu1 %v3395_v42 }
 0x211   : > { %v3341_v23 = vadd.f32 %v6229_v56, %v3303_v34  ;;  %4719 = vmatprep.mubr.bf16.mxu1 %v3396_v32  ;;  %v3372_v47 = vmax.f32 %v3340_v60, 0.0 }
 0x212   : > { %v3339_v39 = vadd.f32 %v6229_v56, %v3301_v62  ;;  %v4681_v54 = vpop.f32.mrb[48].mxu0  ;;  %v3370_v30 = vmax.f32 %v3338_v10, 0.0 }
 0x213   : > { %v3373_v4 = vmax.f32 %v3341_v23, 0.0  ;;  %v3201_v44 = vadd.f32 %v4681_v54, %v6192_v25  ;;  %v3054_v22 = vpop.f32.mrb[49].mxu0 }
 0x214   : > { %v3371_v58 = vmax.f32 %v3339_v39, 0.0  ;;  %v3199_v61 = vadd.f32 %v3054_v22, %v6177_v43  ;;  %v4682_v33 = vpop.f32.mrb[50].mxu0 }
 0x215   : > { %v3306_v63 = vmul.f32 %v6215_v38, %v3201_v44  ;;  %v3202_v41 = vadd.f32 %v4682_v33, %v6198_v11  ;;  %v3057_v3 = vpop.f32.mrb[51].mxu0  ;;  %v3398_v35 = vpack.c.bf16 %v3373_v4, %v3372_v47 }
 0x216   : > { %v3304_v9 = vmul.f32 %v6215_v38, %v3199_v61  ;;  %v3200_v16 = vadd.f32 %v3057_v3, %v6183_v17  ;;  %v3397_v5 = vpack.c.bf16 %v3371_v58, %v3370_v30 }
 0x217   : > { %v3344_v19 = vadd.f32 %v6229_v56, %v3306_v63  ;;  %v3307_v25 = vmul.f32 %v6215_v38, %v3202_v41 }
 0x218   : > { %v3342_v49 = vadd.f32 %v6229_v56, %v3304_v9  ;;  %v3305_v43 = vmul.f32 %v6215_v38, %v3200_v16  ;;  %4720 = vmatmul.mubr.bf16.gmra.mrb[72].mxu1 %v3397_v5 }
 0x219   : > { %v3345_v50 = vadd.f32 %v6229_v56, %v3307_v25  ;;  %4723 = vmatprep.mubr.bf16.mxu1 %v3398_v35  ;;  %v3376_v24 = vmax.f32 %v3344_v19, 0.0 }
 0x21a   : > { %v3343_v11 = vadd.f32 %v6229_v56, %v3305_v43  ;;  %v4685_v7 = vpop.f32.mrb[52].mxu0  ;;  %v3374_v55 = vmax.f32 %v3342_v49, 0.0 }
 0x21b   : > { %v3377_v45 = vmax.f32 %v3345_v50, 0.0  ;;  %v3205_v17 = vadd.f32 %v4685_v7, %v6204_v57  ;;  %v3070_v52 = vpop.f32.mrb[53].mxu0 }
 0x21c   : > { %v3375_v21 = vmax.f32 %v3343_v11, 0.0  ;;  %v3203_v26 = vadd.f32 %v3070_v52, %v6189_v0  ;;  %v4686_v27 = vpop.f32.mrb[54].mxu0 }
 0x21d   : > { %v3310_v59 = vmul.f32 %v6215_v38, %v3205_v17  ;;  %v3206_v12 = vadd.f32 %v4686_v27, %v6210_v29  ;;  %v3073_v13 = vpop.f32.mrb[55].mxu0  ;;  %v3400_v14 = vpack.c.bf16 %v3377_v45, %v3376_v24 }
 0x21e   : > { %v3308_v1 = vmul.f32 %v6215_v38, %v3203_v26  ;;  %v3204_v31 = vadd.f32 %v3073_v13, %v6195_v15  ;;  %v3399_v48 = vpack.c.bf16 %v3375_v21, %v3374_v55 }
 0x21f   : > { %v3348_v36 = vadd.f32 %v6229_v56, %v3310_v59  ;;  %v3311_v57 = vmul.f32 %v6215_v38, %v3206_v12 }
 0x220   : > { %v3346_v32 = vadd.f32 %v6229_v56, %v3308_v1  ;;  %v3309_v0 = vmul.f32 %v6215_v38, %v3204_v31  ;;  %4724 = vmatmul.mubr.bf16.gmra.mrb[76].mxu1 %v3399_v48 }
 0x221   : > { %v3349_v2 = vadd.f32 %v6229_v56, %v3311_v57  ;;  %4727 = vmatprep.mubr.bf16.mxu1 %v3400_v14  ;;  %v3380_v42 = vmax.f32 %v3348_v36, 0.0 }
 0x222   : > { %v3347_v29 = vadd.f32 %v6229_v56, %v3309_v0  ;;  %v4689_v51 = vpop.f32.mrb[56].mxu0  ;;  %v3378_v10 = vmax.f32 %v3346_v32, 0.0 }
 0x223   : > { %v3381_v60 = vmax.f32 %v3349_v2, 0.0  ;;  %v3209_v15 = vadd.f32 %v4689_v51, %v6221_v28  ;;  %v3086_v34 = vpop.f32.mrb[57].mxu0 }
 0x224   : > { %v3379_v62 = vmax.f32 %v3347_v29, 0.0  ;;  %v3207_v23 = vadd.f32 %v3086_v34, %v6201_v6  ;;  %v4690_v39 = vpop.f32.mrb[58].mxu0 }
 0x225   : > { %v3314_v54 = vmul.f32 %v6215_v38, %v3209_v15  ;;  %v3210_v47 = vadd.f32 %v4690_v39, %v6233_v20  ;;  %v3089_v4 = vpop.f32.mrb[59].mxu0  ;;  %v3402_v44 = vpack.c.bf16 %v3381_v60, %v3380_v42 }
 0x226   : > { %v3312_v22 = vmul.f32 %v6215_v38, %v3207_v23  ;;  %v3208_v30 = vadd.f32 %v3089_v4, %v6207_v18  ;;  %v3401_v58 = vpack.c.bf16 %v3379_v62, %v3378_v10 }
 0x227   : > { %v3352_v61 = vadd.f32 %v6229_v56, %v3314_v54  ;;  %v3315_v28 = vmul.f32 %v6215_v38, %v3210_v47 }
 0x228   : > { %v3350_v33 = vadd.f32 %v6229_v56, %v3312_v22  ;;  %v3313_v6 = vmul.f32 %v6215_v38, %v3208_v30  ;;  %4728 = vmatmul.mubr.bf16.gmra.mrb[80].mxu1 %v3401_v58 }
 0x229   : > { %v3353_v63 = vadd.f32 %v6229_v56, %v3315_v28  ;;  %4731 = vmatprep.mubr.bf16.mxu1 %v3402_v44  ;;  %v3384_v3 = vmax.f32 %v3352_v61, 0.0 }
 0x22a   : > { %v3351_v20 = vadd.f32 %v6229_v56, %v3313_v6  ;;  %v4693_v41 = vpop.f32.mrb[60].mxu0  ;;  %v3382_v16 = vmax.f32 %v3350_v33, 0.0 }
 0x22b   : > { %v3385_v35 = vmax.f32 %v3353_v63, 0.0  ;;  %v3213_v18 = vadd.f32 %v4693_v41, %v6240_v37  ;;  %v3102_v9 = vpop.f32.mrb[61].mxu0 }
 0x22c   : > { %v3383_v5 = vmax.f32 %v3351_v20, 0.0  ;;  %v3211_v19 = vadd.f32 %v3102_v9, %v6218_v46  ;;  %v4694_v25 = vpop.f32.mrb[62].mxu0 }
 0x22d   : > { %v3318_v49 = vmul.f32 %v6215_v38, %v3213_v18  ;;  %v3214_v43 = vadd.f32 %v4694_v25, %v6248_v53  ;;  %v3105_v50 = vpop.f32.mrb[63].mxu0  ;;  %v3404_v11 = vpack.c.bf16 %v3385_v35, %v3384_v3 }
 0x22e   : > { %v3316_v7 = vmul.f32 %v6215_v38, %v3211_v19  ;;  %v3212_v24 = vadd.f32 %v3105_v50, %v6224_v40  ;;  %v3403_v45 = vpack.c.bf16 %v3383_v5, %v3382_v16 }
 0x22f   : > { %v3356_v17 = vadd.f32 %v6229_v56, %v3318_v49  ;;  %v3319_v37 = vmul.f32 %v6215_v38, %v3214_v43 }
 0x230   : > { %v3354_v52 = vadd.f32 %v6229_v56, %v3316_v7  ;;  %v3317_v46 = vmul.f32 %v6215_v38, %v3212_v24  ;;  %4732 = vmatmul.mubr.bf16.gmra.mrb[84].mxu1 %v3403_v45  ;;  %v6340_v38 = vld [vmem:[%s6425_s5] ss:$0 sm:$0xff] }
 0x231   : > { %v3357_v55 = vadd.f32 %v6229_v56, %v3319_v37  ;;  %4735 = vmatprep.mubr.bf16.mxu1 %v3404_v11  ;;  %v3388_v21 = vmax.f32 %v3356_v17, 0.0 }
 0x232   : > { %v3355_v53 = vadd.f32 %v6229_v56, %v3317_v46  ;;  %v3386_v27 = vmax.f32 %v3354_v52, 0.0 }
 0x233   : > { %v3389_v26 = vmax.f32 %v3357_v55, 0.0 }
 0x234   : > { %v3387_v40 = vmax.f32 %v3355_v53, 0.0 }
 0x235   : > { %v3406_v59 = vpack.c.bf16 %v3389_v26, %v3388_v21 }
 0x236   : > { %v3405_v12 = vpack.c.bf16 %v3387_v40, %v3386_v27 }
 0x238   : > { %4736 = vmatmul.mubr.bf16.gmra.mrb[88].mxu1 %v3405_v12 }
 0x239   : > { %4739 = vmatprep.mubr.bf16.mxu1 %v3406_v59 }
 0x240   : > { %4740 = vmatmul.mubr.bf16.gmra.mrb[92].mxu1 %v6265_v8 }
 0x2db   : > { %v4713_v56 = vpop.f32.mrb[64].mxu1 }
 0x2dc   : > { %v3522_v13 = vadd.f32 %v4713_v56, %v6340_v38  ;;  %v3513_v8 = vpop.f32.mrb[65].mxu1 }
 0x2dd   : > { %v3514_v14 = vadd.f32 %v6340_v38, %v3513_v8  ;;  %v4714_v1 = vpop.f32.mrb[66].mxu1 }
 0x2de   : > { %3642 = vst [vmem:[%s6345_s30 + $0x10] sm:$0xff] %v3522_v13  ;;  %v3525_v31 = vadd.f32 %v4714_v1, %v6340_v38  ;;  %v3516_v48 = vpop.f32.mrb[67].mxu1 }
 0x2df   : > { %3640 = vst [vmem:[%s6345_s30] sm:$0xff] %v3514_v14  ;;  %v3517_v36 = vadd.f32 %v6340_v38, %v3516_v48 }
 0x2e0   : > { %3643 = vst [vmem:[%s6345_s30 + $0x18] sm:$0xff] %v3525_v31 }
 0x2e1   : > { %3641 = vst [vmem:[%s6345_s30 + $0x8] sm:$0xff] %v3517_v36 }
 0x2e3   : > { %v4717_v57 = vpop.f32.mrb[68].mxu1 }
 0x2e4   : > { %v3538_v32 = vadd.f32 %v4717_v57, %v6340_v38  ;;  %v3529_v0 = vpop.f32.mrb[69].mxu1 }
 0x2e5   : > { %v3530_v2 = vadd.f32 %v6340_v38, %v3529_v0  ;;  %v4718_v29 = vpop.f32.mrb[70].mxu1 }
 0x2e6   : > { %3646 = vst [vmem:[%s6345_s30 + $0x30] sm:$0xff] %v3538_v32  ;;  %v3541_v51 = vadd.f32 %v4718_v29, %v6340_v38  ;;  %v3532_v42 = vpop.f32.mrb[71].mxu1 }
 0x2e7   : > { %3644 = vst [vmem:[%s6345_s30 + $0x20] sm:$0xff] %v3530_v2  ;;  %v3533_v60 = vadd.f32 %v6340_v38, %v3532_v42 }
 0x2e8   : > { %3647 = vst [vmem:[%s6345_s30 + $0x38] sm:$0xff] %v3541_v51 }
 0x2e9   : > { %3645 = vst [vmem:[%s6345_s30 + $0x28] sm:$0xff] %v3533_v60 }
 0x2eb   : > { %v4721_v15 = vpop.f32.mrb[72].mxu1 }
 0x2ec   : > { %v3554_v34 = vadd.f32 %v4721_v15, %v6340_v38  ;;  %v3545_v10 = vpop.f32.mrb[73].mxu1 }
 0x2ed   : > { %v3546_v62 = vadd.f32 %v6340_v38, %v3545_v10  ;;  %v4722_v23 = vpop.f32.mrb[74].mxu1 }
 0x2ee   : > { %3650 = vst [vmem:[%s6345_s30 + $0x50] sm:$0xff] %v3554_v34  ;;  %v3557_v39 = vadd.f32 %v4722_v23, %v6340_v38  ;;  %v3548_v54 = vpop.f32.mrb[75].mxu1 }
 0x2ef   : > { %3648 = vst [vmem:[%s6345_s30 + $0x40] sm:$0xff] %v3546_v62  ;;  %v3549_v47 = vadd.f32 %v6340_v38, %v3548_v54 }
 0x2f0   : > { %3651 = vst [vmem:[%s6345_s30 + $0x58] sm:$0xff] %v3557_v39 }
 0x2f1   : > { %3649 = vst [vmem:[%s6345_s30 + $0x48] sm:$0xff] %v3549_v47 }
 0x2f3   : > { %v4725_v4 = vpop.f32.mrb[76].mxu1 }
 0x2f4   : > { %v3570_v44 = vadd.f32 %v4725_v4, %v6340_v38  ;;  %v3561_v22 = vpop.f32.mrb[77].mxu1 }
 0x2f5   : > { %v3562_v30 = vadd.f32 %v6340_v38, %v3561_v22  ;;  %v4726_v58 = vpop.f32.mrb[78].mxu1 }
 0x2f6   : > { %3654 = vst [vmem:[%s6345_s30 + $0x70] sm:$0xff] %v3570_v44  ;;  %v3573_v61 = vadd.f32 %v4726_v58, %v6340_v38  ;;  %v3564_v28 = vpop.f32.mrb[79].mxu1 }
 0x2f7   : > { %3652 = vst [vmem:[%s6345_s30 + $0x60] sm:$0xff] %v3562_v30  ;;  %v3565_v33 = vadd.f32 %v6340_v38, %v3564_v28 }
 0x2f8   : > { %3655 = vst [vmem:[%s6345_s30 + $0x78] sm:$0xff] %v3573_v61 }
 0x2f9   : > { %3653 = vst [vmem:[%s6345_s30 + $0x68] sm:$0xff] %v3565_v33 }
 0x2fb   : > { %v4729_v6 = vpop.f32.mrb[80].mxu1 }
 0x2fc   : > { %v3586_v63 = vadd.f32 %v4729_v6, %v6340_v38  ;;  %v3577_v20 = vpop.f32.mrb[81].mxu1 }
 0x2fd   : > { %v3578_v41 = vadd.f32 %v6340_v38, %v3577_v20  ;;  %v4730_v3 = vpop.f32.mrb[82].mxu1 }
 0x2fe   : > { %3658 = vst [vmem:[%s6345_s30 + $0x90] sm:$0xff] %v3586_v63  ;;  %v3589_v35 = vadd.f32 %v4730_v3, %v6340_v38  ;;  %v3580_v18 = vpop.f32.mrb[83].mxu1 }
 0x2ff   : > { %3656 = vst [vmem:[%s6345_s30 + $0x80] sm:$0xff] %v3578_v41  ;;  %v3581_v9 = vadd.f32 %v6340_v38, %v3580_v18 }
 0x300   : > { %3659 = vst [vmem:[%s6345_s30 + $0x98] sm:$0xff] %v3589_v35 }
 0x301   : > { %3657 = vst [vmem:[%s6345_s30 + $0x88] sm:$0xff] %v3581_v9 }
 0x303   : > { %v4733_v16 = vpop.f32.mrb[84].mxu1 }
 0x304   : > { %v3602_v5 = vadd.f32 %v4733_v16, %v6340_v38  ;;  %v3593_v19 = vpop.f32.mrb[85].mxu1 }
 0x305   : > { %v3594_v25 = vadd.f32 %v6340_v38, %v3593_v19  ;;  %v4734_v49 = vpop.f32.mrb[86].mxu1 }
 0x306   : > { %3662 = vst [vmem:[%s6345_s30 + $0xb0] sm:$0xff] %v3602_v5  ;;  %v3605_v43 = vadd.f32 %v4734_v49, %v6340_v38  ;;  %v3596_v50 = vpop.f32.mrb[87].mxu1 }
 0x307   : > { %3660 = vst [vmem:[%s6345_s30 + $0xa0] sm:$0xff] %v3594_v25  ;;  %v3597_v11 = vadd.f32 %v6340_v38, %v3596_v50 }
 0x308   : > { %3663 = vst [vmem:[%s6345_s30 + $0xb8] sm:$0xff] %v3605_v43 }
 0x309   : > { %3661 = vst [vmem:[%s6345_s30 + $0xa8] sm:$0xff] %v3597_v11 }
 0x30b   : > { %v4737_v7 = vpop.f32.mrb[88].mxu1 }
 0x30c   : > { %v3618_v24 = vadd.f32 %v4737_v7, %v6340_v38  ;;  %v3609_v45 = vpop.f32.mrb[89].mxu1 }
 0x30d   : > { %v3610_v17 = vadd.f32 %v6340_v38, %v3609_v45  ;;  %v4738_v37 = vpop.f32.mrb[90].mxu1 }
 0x30e   : > { %3666 = vst [vmem:[%s6345_s30 + $0xd0] sm:$0xff] %v3618_v24  ;;  %v3621_v52 = vadd.f32 %v4738_v37, %v6340_v38  ;;  %v3612_v46 = vpop.f32.mrb[91].mxu1 }
 0x30f   : > { %3664 = vst [vmem:[%s6345_s30 + $0xc0] sm:$0xff] %v3610_v17  ;;  %v3613_v55 = vadd.f32 %v6340_v38, %v3612_v46 }
 0x310   : > { %3667 = vst [vmem:[%s6345_s30 + $0xd8] sm:$0xff] %v3621_v52 }
 0x311   : > { %3665 = vst [vmem:[%s6345_s30 + $0xc8] sm:$0xff] %v3613_v55 }
 0x313   : > { %v4741_v53 = vpop.f32.mrb[92].mxu1 }
 0x314   : > { %v3634_v21 = vadd.f32 %v4741_v53, %v6340_v38  ;;  %v3625_v26 = vpop.f32.mrb[93].mxu1 }
 0x315   : > { %v3626_v27 = vadd.f32 %v6340_v38, %v3625_v26  ;;  %v4742_v40 = vpop.f32.mrb[94].mxu1 }
 0x316   : > { %3670 = vst [vmem:[%s6345_s30 + $0xf0] sm:$0xff] %v3634_v21  ;;  %v3637_v59 = vadd.f32 %v4742_v40, %v6340_v38  ;;  %v3628_v12 = vpop.f32.mrb[95].mxu1 }
 0x317   : > { %3668 = vst [vmem:[%s6345_s30 + $0xe0] sm:$0xff] %v3626_v27  ;;  %v3629_v56 = vadd.f32 %v6340_v38, %v3628_v12 }
 0x318   : > { %3671 = vst [vmem:[%s6345_s30 + $0xf8] sm:$0xff] %v3637_v59 }
 0x319   : > { %3669 = vst [vmem:[%s6345_s30 + $0xe8] sm:$0xff] %v3629_v56 }
 0x31a PF: > { %s16_s23 = sadd.s32 1, %s5022_s23   ;;  %s6591_s21 = smov %s5018_s22 }
 0x31b   : > { %p13_p5 = scmp.ge.s32.totalorder %s16_s23, 4   ;;  %s6592_s22 = smov %s6594_s24 }
 0x31d   :  { %15 = sbr.rel (!%p13_p5) target bundleno = 2 (0x2), region = 97 }

</bundles_post_ra>
